<compile_context>
chip_gen: v7x
topology: tpu7x:2x2x1
jax: 0.10.0
libtpu: 0.0.40
codegen_flags: <defaults>
</compile_context>

<pallas_src>
import jax
import jax.numpy as jnp
from jax import lax
from jax.experimental import pallas as pl
from jax.experimental.pallas import tpu as pltpu

# ---- static shape constants (derived from the module) ----------------------
N_CLASSES = 4
MAX_SEQ_LEN = 99          # ((99-6)//3 - 4)//3 == 9  -> flatten = 50*9 = 450
EMB_DIM = 64
NUM_FEATURES = 50
BATCH = 2

C_REAL = 50               # real conv channels
CP = 128                  # padded channel width (full lane width)
K1, K2 = 7, 5
L0 = MAX_SEQ_LEN          # 99
L1 = L0 - K1 + 1          # 93  conv1 output length (per batch element)
P1 = L1 // 3              # 31  pool1 output length
L2 = P1 - K2 + 1          # 27  conv2 output length
P2 = L2 // 3              # 9   pool2 output length -> flatten 450
FC1_IN = C_REAL * P2      # 450
FC1_OUT = 200
FC1_OUT_PAD = 256
NC_PAD = 128

# batch stacked along the sublane axis
M1 = BATCH * L0 - K1 + 1  # 192  rows of batch-stacked conv1 output (straddle rows unused)
R1 = BATCH * P1           # 62   rows of stacked pool1 output
M2 = R1 - K2 + 1          # 58   rows of batch-stacked conv2 output (straddle rows unused)
R2 = BATCH * P2           # 18   rows of stacked pool2 output

K1_IM2COL = K1 * EMB_DIM  # 448  conv1 contraction depth
K2_IM2COL = K2 * CP       # 640  conv2 contraction depth
KFC1 = P2 * CP            # 1152 fc1 contraction depth


# ---- Pallas kernel: whole batch in one invocation ---------------------------
def charcnn_kernel(x_ref, wconv_ref, bias_ref, wfc1_hbm, wfc2_hbm,
                   out_ref,
                   h1_ref, p1_ref, h2_ref, p2_ref,
                   wfc1_vmem, wfc2_vmem, sem):
    # Kick off the FC-weight DMAs immediately so they overlap conv/pool work.
    cp_fc1 = pltpu.make_async_copy(wfc1_hbm, wfc1_vmem, sem.at[0])
    cp_fc2 = pltpu.make_async_copy(wfc2_hbm, wfc2_vmem, sem.at[1])
    cp_fc1.start()
    cp_fc2.start()

    biases = bias_ref[...]                       # (4, 256) f32
    b1 = biases[0:1, :CP]                        # (1, 128)
    b2 = biases[1:2, :CP]                        # (1, 128)
    bfc1 = biases[2:3, :]                        # (1, 256)
    bfc2 = biases[3:4, :CP]                      # (1, 128) (-1e9 on padded classes)

    # ---- Conv1d(E -> 50, k=7) + bias + ReLU: single im2col matmul -----------
    # x_ref: (M1, 448) bf16, already im2col'd + batch-stacked in the wrapper.
    h1 = jnp.dot(x_ref[...], wconv_ref[pl.ds(0, K1_IM2COL), :],
                 preferred_element_type=jnp.float32)            # (M1, CP)
    h1_ref[...] = jnp.maximum(h1 + b1, 0.0)
    # (rows straddling the batch boundary are garbage but never read below)

    # ---- MaxPool1d(3, 3): 3 strided reads + 2 maxes per batch element -------
    for b in range(BATCH):
        base = b * L0
        p1 = jnp.maximum(
            jnp.maximum(h1_ref[pl.ds(base + 0, P1, stride=3), :],
                        h1_ref[pl.ds(base + 1, P1, stride=3), :]),
            h1_ref[pl.ds(base + 2, P1, stride=3), :])            # (P1, CP)
        p1_ref[pl.ds(b * P1, P1), :] = p1

    # ---- Conv1d(50 -> 50, k=5) + bias + ReLU: single im2col matmul ----------
    # Lane-concat the 5 shifted full-lane slices -> (M2, 640), one matmul.
    lhs2 = jnp.concatenate([p1_ref[pl.ds(k, M2), :] for k in range(K2)], axis=1)
    h2 = jnp.dot(lhs2.astype(jnp.bfloat16),
                 wconv_ref[pl.ds(K1_IM2COL, K2_IM2COL), :],
                 preferred_element_type=jnp.float32)             # (M2, CP)
    h2_ref[...] = jnp.maximum(h2 + b2, 0.0)

    # ---- MaxPool1d(3, 3) -----------------------------------------------------
    for b in range(BATCH):
        base = b * P1
        p2 = jnp.maximum(
            jnp.maximum(h2_ref[pl.ds(base + 0, P2, stride=3), :],
                        h2_ref[pl.ds(base + 1, P2, stride=3), :]),
            h2_ref[pl.ds(base + 2, P2, stride=3), :])            # (P2, CP)
        p2_ref[pl.ds(b * P2, P2), :] = p2

    # ---- Linear(450, 200) + ReLU: single matmul ------------------------------
    # Channel-major torch flatten is folded into the (1152, 256) weight layout;
    # lhs[b, t*CP + c] = pool2[b, t, c] via 9 strided 2-row reads lane-concat'd.
    cp_fc1.wait()                                 # weights arrived during conv work
    lhs_fc1 = jnp.concatenate(
        [p2_ref[pl.ds(t, BATCH, stride=P2), :] for t in range(P2)], axis=1)  # (B, 1152)
    z1 = jnp.dot(lhs_fc1.astype(jnp.bfloat16), wfc1_vmem[...],
                 preferred_element_type=jnp.float32)             # (B, 256)
    z1 = jnp.maximum(z1 + bfc1, 0.0)
    # TODO(synk): nn.Dropout(0.1) is identity in eval mode; training-mode PRNG mask not implemented.

    # ---- Linear(200, n_classes) + Softmax (padded classes have bias -1e9) ---
    cp_fc2.wait()
    z2 = jnp.dot(z1.astype(jnp.bfloat16), wfc2_vmem[...],
                 preferred_element_type=jnp.float32) + bfc2      # (B, NC_PAD)
    m = jnp.max(z2, axis=-1, keepdims=True)
    e = jnp.exp(z2 - m)                           # exp(-1e9 - m) == 0 on padded lanes
    inv = pl.reciprocal(jnp.sum(e, axis=-1, keepdims=True), approx=True)
    out_ref[...] = e * inv                        # lane-dense (B, 128) store


# ---- one-time parameter relayout (outside the per-call jit path) ------------
def prepare_params(params):
    cpad = CP - C_REAL

    # Conv1 (out, in, k) -> im2col layout [(k*E + e), c], channel-padded.
    w1 = jnp.transpose(params["w_conv1"], (2, 1, 0))                 # (K1, E, 50)
    w1 = jnp.pad(w1, ((0, 0), (0, 0), (0, cpad)))                    # (K1, E, CP)
    w1 = w1.reshape(K1_IM2COL, CP)                                   # (448, 128)

    # Conv2 (out, in, k) -> im2col layout [(k*CP + cin), cout], both padded.
    w2 = jnp.transpose(params["w_conv2"], (2, 1, 0))                 # (K2, 50, 50)
    w2 = jnp.pad(w2, ((0, 0), (0, cpad), (0, cpad)))                 # (K2, CP, CP)
    w2 = w2.reshape(K2_IM2COL, CP)                                   # (640, 128)

    wconv = jnp.concatenate([w1, w2], axis=0).astype(jnp.bfloat16)   # (1088, 128)

    # Linear(450,200): torch flattens (C, P2) channel-major -> flat[c*P2 + t].
    # Re-layout to [(t*CP + c), o] so the kernel's lane-concat lhs matches.
    wfc1 = params["w_fc1"].T.reshape(C_REAL, P2, FC1_OUT)            # (50, 9, 200)
    wfc1 = jnp.transpose(wfc1, (1, 0, 2))                            # (9, 50, 200)
    wfc1 = jnp.pad(wfc1, ((0, 0), (0, cpad), (0, FC1_OUT_PAD - FC1_OUT)))
    wfc1 = wfc1.reshape(KFC1, FC1_OUT_PAD).astype(jnp.bfloat16)      # (1152, 256)

    # Linear(200, n_classes): pad K to 256, classes to 128 (zeros).
    wfc2 = jnp.pad(params["w_fc2"].T,
                   ((0, FC1_OUT_PAD - FC1_OUT), (0, NC_PAD - N_CLASSES))
                   ).astype(jnp.bfloat16)                            # (256, 128)

    # All biases stacked into one (4, 256) f32 slab -> single small DMA.
    b1 = jnp.pad(params["b_conv1"], (0, FC1_OUT_PAD - C_REAL))
    b2 = jnp.pad(params["b_conv2"], (0, FC1_OUT_PAD - C_REAL))
    bfc1 = jnp.pad(params["b_fc1"], (0, FC1_OUT_PAD - FC1_OUT))
    bfc2 = jnp.pad(params["b_fc2"], (0, NC_PAD - N_CLASSES), constant_values=-1e9)
    bfc2 = jnp.pad(bfc2, (0, FC1_OUT_PAD - NC_PAD))
    biases = jnp.stack([b1, b2, bfc1, bfc2], axis=0).astype(jnp.float32)  # (4, 256)

    return {"emb": params["emb"].astype(jnp.float32),
            "wconv": wconv, "biases": biases, "wfc1": wfc1, "wfc2": wfc2}


# ---- wrapper: embedding gather + im2col + single pallas_call -----------------
@jax.jit
def charcnn_forward(token_ids, prep):
    emb = jnp.take(prep["emb"], token_ids, axis=0)               # (B, L0, E) f32
    x = emb.reshape(BATCH * L0, EMB_DIM).astype(jnp.bfloat16)    # bf16 once, batch-stacked
    # conv1 im2col lhs: (M1, K1*E) bf16 -- one MXU-depth-filled matmul in-kernel.
    x_im2col = jnp.concatenate([x[k:k + M1, :] for k in range(K1)], axis=1)

    vmem = pl.BlockSpec(memory_space=pltpu.MemorySpace.VMEM)
    anyspec = pl.BlockSpec(memory_space=pl.ANY)
    out = pl.pallas_call(
        charcnn_kernel,
        out_shape=jax.ShapeDtypeStruct((BATCH, NC_PAD), jnp.float32),
        in_specs=[vmem, vmem, vmem, anyspec, anyspec],
        out_specs=vmem,
        scratch_shapes=[
            pltpu.VMEM((M1, CP), jnp.float32),            # conv1 + relu (batch-stacked)
            pltpu.VMEM((R1, CP), jnp.float32),            # pool1 (batch-stacked)
            pltpu.VMEM((M2, CP), jnp.float32),            # conv2 + relu (batch-stacked)
            pltpu.VMEM((R2, CP), jnp.float32),            # pool2 (batch-stacked)
            pltpu.VMEM((KFC1, FC1_OUT_PAD), jnp.bfloat16),  # wfc1 staging (async DMA)
            pltpu.VMEM((FC1_OUT_PAD, NC_PAD), jnp.bfloat16),  # wfc2 staging (async DMA)
            pltpu.SemaphoreType.DMA((2,)),
        ],
    )(x_im2col, prep["wconv"], prep["biases"], prep["wfc1"], prep["wfc2"])
    return out[:, :N_CLASSES]


# ---- pure-JAX reference (mirrors the PyTorch forward exactly) ---------------
def charcnn_reference(token_ids, params):
    x = jnp.take(params["emb"], token_ids, axis=0)               # (B, L, E)
    x = jnp.transpose(x, (0, 2, 1))                              # (B, E, L) == permute(0,2,1)
    dn = ("NCH", "OIH", "NCH")
    x = lax.conv_general_dilated(x, params["w_conv1"], (1,), "VALID",
                                 dimension_numbers=dn)
    x = jnp.maximum(x + params["b_conv1"][None, :, None], 0.0)
    x = lax.reduce_window(x, -jnp.inf, lax.max, (1, 1, 3), (1, 1, 3), "VALID")
    x = lax.conv_general_dilated(x, params["w_conv2"], (1,), "VALID",
                                 dimension_numbers=dn)
    x = jnp.maximum(x + params["b_conv2"][None, :, None], 0.0)
    x = lax.reduce_window(x, -jnp.inf, lax.max, (1, 1, 3), (1, 1, 3), "VALID")
    x = x.reshape(x.shape[0], -1)                                # (B, 450) channel-major
    x = jnp.maximum(x @ params["w_fc1"].T + params["b_fc1"], 0.0)
    x = x @ params["w_fc2"].T + params["b_fc2"]
    return jax.nn.softmax(x, axis=-1)


def init_params(key):
    ks = jax.random.split(key, 9)
    s = 0.1
    return {
        "emb":     jax.random.normal(ks[0], (NUM_FEATURES + 1, EMB_DIM), jnp.float32) * s,
        "w_conv1": jax.random.normal(ks[1], (C_REAL, EMB_DIM, K1), jnp.float32) * s,
        "b_conv1": jax.random.normal(ks[2], (C_REAL,), jnp.float32) * s,
        "w_conv2": jax.random.normal(ks[3], (C_REAL, C_REAL, K2), jnp.float32) * s,
        "b_conv2": jax.random.normal(ks[4], (C_REAL,), jnp.float32) * s,
        "w_fc1":   jax.random.normal(ks[5], (FC1_OUT, FC1_IN), jnp.float32) * s,
        "b_fc1":   jax.random.normal(ks[6], (FC1_OUT,), jnp.float32) * s,
        "w_fc2":   jax.random.normal(ks[7], (N_CLASSES, FC1_OUT), jnp.float32) * s,
        "b_fc2":   jax.random.normal(ks[8], (N_CLASSES,), jnp.float32) * s,
    }


if __name__ == "__main__":
    key = jax.random.PRNGKey(0)
    k_ids, k_params = jax.random.split(key)
    params = init_params(k_params)
    prep = prepare_params(params)          # one-time relayout, outside the jit'd forward
    token_ids = jax.random.randint(k_ids, (BATCH, MAX_SEQ_LEN), 0,
                                   NUM_FEATURES + 1, dtype=jnp.int32)

    out = jax.block_until_ready(charcnn_forward(token_ids, prep))
    ref = jax.block_until_ready(charcnn_reference(token_ids, params))

    assert out.shape == (BATCH, N_CLASSES)
    assert jnp.allclose(jnp.sum(out, axis=-1), 1.0, atol=1e-2)
    assert jnp.allclose(out, ref, atol=2e-2, rtol=2e-2), (out, ref)

    print("KERNEL_OK")
</pallas_src>

<mosaic_0001>
module attributes {stable_mosaic.version = 11 : i64} {
  func.func @charcnn_kernel(%arg0: memref<192x448xbf16, #tpu.memory_space<vmem>>, %arg1: memref<1088x128xbf16, #tpu.memory_space<vmem>>, %arg2: memref<4x256xf32, #tpu.memory_space<vmem>>, %arg3: memref<1152x256xbf16, #tpu.memory_space<any>>, %arg4: memref<256x128xbf16, #tpu.memory_space<any>>, %arg5: memref<2x128xf32, #tpu.memory_space<vmem>>, %arg6: memref<192x128xf32, #tpu.memory_space<vmem>>, %arg7: memref<62x128xf32, #tpu.memory_space<vmem>>, %arg8: memref<58x128xf32, #tpu.memory_space<vmem>>, %arg9: memref<18x128xf32, #tpu.memory_space<vmem>>, %arg10: memref<1152x256xbf16, #tpu.memory_space<vmem>>, %arg11: memref<256x128xbf16, #tpu.memory_space<vmem>>, %arg12: memref<2x!tpu.dma_semaphore, #tpu.memory_space<semaphore_mem>>) attributes {dimension_semantics = [], scalar_prefetch = 0 : i64, scratch_operands = 7 : i64, tpu.core_type = #tpu.core_type<tc>} {
    %c0_i32 = arith.constant 0 : i32
    %0 = tpu.memref_slice %arg12[%c0_i32] : memref<2x!tpu.dma_semaphore, #tpu.memory_space<semaphore_mem>> -> memref<1x!tpu.dma_semaphore, #tpu.memory_space<semaphore_mem>>
    %1 = tpu.memref_squeeze %0 : memref<1x!tpu.dma_semaphore, #tpu.memory_space<semaphore_mem>> -> memref<!tpu.dma_semaphore, #tpu.memory_space<semaphore_mem>>
    tpu.enqueue_dma source(%arg3 : memref<1152x256xbf16, #tpu.memory_space<any>>) target(%arg10 : memref<1152x256xbf16, #tpu.memory_space<vmem>>) target_semaphore(%1 : memref<!tpu.dma_semaphore, #tpu.memory_space<semaphore_mem>>)
    %c1_i32 = arith.constant 1 : i32
    %2 = tpu.memref_slice %arg12[%c1_i32] : memref<2x!tpu.dma_semaphore, #tpu.memory_space<semaphore_mem>> -> memref<1x!tpu.dma_semaphore, #tpu.memory_space<semaphore_mem>>
    %3 = tpu.memref_squeeze %2 : memref<1x!tpu.dma_semaphore, #tpu.memory_space<semaphore_mem>> -> memref<!tpu.dma_semaphore, #tpu.memory_space<semaphore_mem>>
    tpu.enqueue_dma source(%arg4 : memref<256x128xbf16, #tpu.memory_space<any>>) target(%arg11 : memref<256x128xbf16, #tpu.memory_space<vmem>>) target_semaphore(%3 : memref<!tpu.dma_semaphore, #tpu.memory_space<semaphore_mem>>)
    %c0 = arith.constant 0 : index
    %c0_0 = arith.constant 0 : index
    %4 = vector.load %arg2[%c0, %c0_0] : memref<4x256xf32, #tpu.memory_space<vmem>>, vector<4x256xf32>
    %5 = vector.extract_strided_slice %4 {offsets = [0, 0], sizes = [1, 128], strides = [1, 1]} : vector<4x256xf32> to vector<1x128xf32>
    %6 = vector.extract_strided_slice %4 {offsets = [1, 0], sizes = [1, 128], strides = [1, 1]} : vector<4x256xf32> to vector<1x128xf32>
    %7 = vector.extract_strided_slice %4 {offsets = [2, 0], sizes = [1, 256], strides = [1, 1]} : vector<4x256xf32> to vector<1x256xf32>
    %8 = vector.extract_strided_slice %4 {offsets = [3, 0], sizes = [1, 128], strides = [1, 1]} : vector<4x256xf32> to vector<1x128xf32>
    %c0_1 = arith.constant 0 : index
    %c0_2 = arith.constant 0 : index
    %9 = vector.load %arg0[%c0_1, %c0_2] : memref<192x448xbf16, #tpu.memory_space<vmem>>, vector<192x448xbf16>
    %c0_3 = arith.constant 0 : index
    %c0_4 = arith.constant 0 : index
    %10 = vector.load %arg1[%c0_3, %c0_4] : memref<1088x128xbf16, #tpu.memory_space<vmem>>, vector<448x128xbf16>
    %cst = arith.constant dense<0.000000e+00> : vector<192x128xf32>
    %11 = tpu.matmul %9, %10, %cst {dimension_numbers = #tpu.dot_dimension_numbers<[1], [0], [0], [1], [0, 0, 1, 1], [], []>} : vector<192x448xbf16>, vector<448x128xbf16>, vector<192x128xf32> -> vector<192x128xf32>
    %12 = vector.broadcast %5 : vector<1x128xf32> to vector<192x128xf32>
    %13 = arith.addf %11, %12 : vector<192x128xf32>
    %cst_5 = arith.constant 0.000000e+00 : f32
    %14 = vector.broadcast %cst_5 : f32 to vector<192x128xf32>
    %15 = arith.maximumf %13, %14 : vector<192x128xf32>
    %c0_6 = arith.constant 0 : index
    %c0_7 = arith.constant 0 : index
    %16 = vector.load %arg6[%c0_6, %c0_7] : memref<192x128xf32, #tpu.memory_space<vmem>>, vector<192x128xf32>
    tpu.vector_store %arg6[%c0_6, %c0_7], %15 {strides = array<i32>} : memref<192x128xf32, #tpu.memory_space<vmem>>, vector<192x128xf32>,
    %c0_8 = arith.constant 0 : index
    %c0_9 = arith.constant 0 : index
    %17 = tpu.strided_load %arg6[%c0_8, %c0_9] {strides = array<i32: 3, 1>} : memref<192x128xf32, #tpu.memory_space<vmem>>, vector<31x128xf32>
    %c1 = arith.constant 1 : index
    %c0_10 = arith.constant 0 : index
    %18 = tpu.strided_load %arg6[%c1, %c0_10] {strides = array<i32: 3, 1>} : memref<192x128xf32, #tpu.memory_space<vmem>>, vector<31x128xf32>
    %19 = arith.maximumf %17, %18 : vector<31x128xf32>
    %c2 = arith.constant 2 : index
    %c0_11 = arith.constant 0 : index
    %20 = tpu.strided_load %arg6[%c2, %c0_11] {strides = array<i32: 3, 1>} : memref<192x128xf32, #tpu.memory_space<vmem>>, vector<31x128xf32>
    %21 = arith.maximumf %19, %20 : vector<31x128xf32>
    %c0_12 = arith.constant 0 : index
    %c0_13 = arith.constant 0 : index
    %22 = vector.load %arg7[%c0_12, %c0_13] : memref<62x128xf32, #tpu.memory_space<vmem>>, vector<31x128xf32>
    tpu.vector_store %arg7[%c0_12, %c0_13], %21 {strides = array<i32>} : memref<62x128xf32, #tpu.memory_space<vmem>>, vector<31x128xf32>,
    %c99 = arith.constant 99 : index
    %c0_14 = arith.constant 0 : index
    %23 = tpu.strided_load %arg6[%c99, %c0_14] {strides = array<i32: 3, 1>} : memref<192x128xf32, #tpu.memory_space<vmem>>, vector<31x128xf32>
    %c100 = arith.constant 100 : index
    %c0_15 = arith.constant 0 : index
    %24 = tpu.strided_load %arg6[%c100, %c0_15] {strides = array<i32: 3, 1>} : memref<192x128xf32, #tpu.memory_space<vmem>>, vector<31x128xf32>
    %25 = arith.maximumf %23, %24 : vector<31x128xf32>
    %c101 = arith.constant 101 : index
    %c0_16 = arith.constant 0 : index
    %26 = tpu.strided_load %arg6[%c101, %c0_16] {strides = array<i32: 3, 1>} : memref<192x128xf32, #tpu.memory_space<vmem>>, vector<31x128xf32>
    %27 = arith.maximumf %25, %26 : vector<31x128xf32>
    %c31 = arith.constant 31 : index
    %c0_17 = arith.constant 0 : index
    %28 = vector.load %arg7[%c31, %c0_17] : memref<62x128xf32, #tpu.memory_space<vmem>>, vector<31x128xf32>
    tpu.vector_store %arg7[%c31, %c0_17], %27 {strides = array<i32>} : memref<62x128xf32, #tpu.memory_space<vmem>>, vector<31x128xf32>,
    %c0_18 = arith.constant 0 : index
    %c0_19 = arith.constant 0 : index
    %29 = vector.load %arg7[%c0_18, %c0_19] : memref<62x128xf32, #tpu.memory_space<vmem>>, vector<58x128xf32>
    %c1_20 = arith.constant 1 : index
    %c0_21 = arith.constant 0 : index
    %30 = vector.load %arg7[%c1_20, %c0_21] : memref<62x128xf32, #tpu.memory_space<vmem>>, vector<58x128xf32>
    %c2_22 = arith.constant 2 : index
    %c0_23 = arith.constant 0 : index
    %31 = vector.load %arg7[%c2_22, %c0_23] : memref<62x128xf32, #tpu.memory_space<vmem>>, vector<58x128xf32>
    %c3 = arith.constant 3 : index
    %c0_24 = arith.constant 0 : index
    %32 = vector.load %arg7[%c3, %c0_24] : memref<62x128xf32, #tpu.memory_space<vmem>>, vector<58x128xf32>
    %c4 = arith.constant 4 : index
    %c0_25 = arith.constant 0 : index
    %33 = vector.load %arg7[%c4, %c0_25] : memref<62x128xf32, #tpu.memory_space<vmem>>, vector<58x128xf32>
    %34 = tpu.concatenate %29, %30, %31, %32, %33 in 1 : vector<58x128xf32>, vector<58x128xf32>, vector<58x128xf32>, vector<58x128xf32>, vector<58x128xf32> -> vector<58x640xf32>
    %35 = arith.truncf %34 : vector<58x640xf32> to vector<58x640xbf16>
    %c448 = arith.constant 448 : index
    %c0_26 = arith.constant 0 : index
    %36 = vector.load %arg1[%c448, %c0_26] : memref<1088x128xbf16, #tpu.memory_space<vmem>>, vector<640x128xbf16>
    %cst_27 = arith.constant dense<0.000000e+00> : vector<58x128xf32>
    %37 = tpu.matmul %35, %36, %cst_27 {dimension_numbers = #tpu.dot_dimension_numbers<[1], [0], [0], [1], [0, 0, 1, 1], [], []>} : vector<58x640xbf16>, vector<640x128xbf16>, vector<58x128xf32> -> vector<58x128xf32>
    %38 = vector.broadcast %6 : vector<1x128xf32> to vector<58x128xf32>
    %39 = arith.addf %37, %38 : vector<58x128xf32>
    %cst_28 = arith.constant 0.000000e+00 : f32
    %40 = vector.broadcast %cst_28 : f32 to vector<58x128xf32>
    %41 = arith.maximumf %39, %40 : vector<58x128xf32>
    %c0_29 = arith.constant 0 : index
    %c0_30 = arith.constant 0 : index
    %42 = vector.load %arg8[%c0_29, %c0_30] : memref<58x128xf32, #tpu.memory_space<vmem>>, vector<58x128xf32>
    tpu.vector_store %arg8[%c0_29, %c0_30], %41 {strides = array<i32>} : memref<58x128xf32, #tpu.memory_space<vmem>>, vector<58x128xf32>,
    %c0_31 = arith.constant 0 : index
    %c0_32 = arith.constant 0 : index
    %43 = tpu.strided_load %arg8[%c0_31, %c0_32] {strides = array<i32: 3, 1>} : memref<58x128xf32, #tpu.memory_space<vmem>>, vector<9x128xf32>
    %c1_33 = arith.constant 1 : index
    %c0_34 = arith.constant 0 : index
    %44 = tpu.strided_load %arg8[%c1_33, %c0_34] {strides = array<i32: 3, 1>} : memref<58x128xf32, #tpu.memory_space<vmem>>, vector<9x128xf32>
    %45 = arith.maximumf %43, %44 : vector<9x128xf32>
    %c2_35 = arith.constant 2 : index
    %c0_36 = arith.constant 0 : index
    %46 = tpu.strided_load %arg8[%c2_35, %c0_36] {strides = array<i32: 3, 1>} : memref<58x128xf32, #tpu.memory_space<vmem>>, vector<9x128xf32>
    %47 = arith.maximumf %45, %46 : vector<9x128xf32>
    %c0_37 = arith.constant 0 : index
    %c0_38 = arith.constant 0 : index
    %48 = vector.load %arg9[%c0_37, %c0_38] : memref<18x128xf32, #tpu.memory_space<vmem>>, vector<9x128xf32>
    tpu.vector_store %arg9[%c0_37, %c0_38], %47 {strides = array<i32>} : memref<18x128xf32, #tpu.memory_space<vmem>>, vector<9x128xf32>,
    %c31_39 = arith.constant 31 : index
    %c0_40 = arith.constant 0 : index
    %49 = tpu.strided_load %arg8[%c31_39, %c0_40] {strides = array<i32: 3, 1>} : memref<58x128xf32, #tpu.memory_space<vmem>>, vector<9x128xf32>
    %c32 = arith.constant 32 : index
    %c0_41 = arith.constant 0 : index
    %50 = tpu.strided_load %arg8[%c32, %c0_41] {strides = array<i32: 3, 1>} : memref<58x128xf32, #tpu.memory_space<vmem>>, vector<9x128xf32>
    %51 = arith.maximumf %49, %50 : vector<9x128xf32>
    %c33 = arith.constant 33 : index
    %c0_42 = arith.constant 0 : index
    %52 = tpu.strided_load %arg8[%c33, %c0_42] {strides = array<i32: 3, 1>} : memref<58x128xf32, #tpu.memory_space<vmem>>, vector<9x128xf32>
    %53 = arith.maximumf %51, %52 : vector<9x128xf32>
    %c9 = arith.constant 9 : index
    %c0_43 = arith.constant 0 : index
    %54 = vector.load %arg9[%c9, %c0_43] : memref<18x128xf32, #tpu.memory_space<vmem>>, vector<9x128xf32>
    tpu.vector_store %arg9[%c9, %c0_43], %53 {strides = array<i32>} : memref<18x128xf32, #tpu.memory_space<vmem>>, vector<9x128xf32>,
    %c0_i32_44 = arith.constant 0 : i32
    %55 = tpu.memref_slice %arg12[%c0_i32_44] : memref<2x!tpu.dma_semaphore, #tpu.memory_space<semaphore_mem>> -> memref<1x!tpu.dma_semaphore, #tpu.memory_space<semaphore_mem>>
    %56 = tpu.memref_squeeze %55 : memref<1x!tpu.dma_semaphore, #tpu.memory_space<semaphore_mem>> -> memref<!tpu.dma_semaphore, #tpu.memory_space<semaphore_mem>>
    tpu.wait_dma2 semaphore(%56 : memref<!tpu.dma_semaphore, #tpu.memory_space<semaphore_mem>>) src(%arg3 : memref<1152x256xbf16, #tpu.memory_space<any>>) dst(%arg10 : memref<1152x256xbf16, #tpu.memory_space<vmem>>)
    %c0_45 = arith.constant 0 : index
    %c0_46 = arith.constant 0 : index
    %57 = tpu.strided_load %arg9[%c0_45, %c0_46] {strides = array<i32: 9, 1>} : memref<18x128xf32, #tpu.memory_space<vmem>>, vector<2x128xf32>
    %c1_47 = arith.constant 1 : index
    %c0_48 = arith.constant 0 : index
    %58 = tpu.strided_load %arg9[%c1_47, %c0_48] {strides = array<i32: 9, 1>} : memref<18x128xf32, #tpu.memory_space<vmem>>, vector<2x128xf32>
    %c2_49 = arith.constant 2 : index
    %c0_50 = arith.constant 0 : index
    %59 = tpu.strided_load %arg9[%c2_49, %c0_50] {strides = array<i32: 9, 1>} : memref<18x128xf32, #tpu.memory_space<vmem>>, vector<2x128xf32>
    %c3_51 = arith.constant 3 : index
    %c0_52 = arith.constant 0 : index
    %60 = tpu.strided_load %arg9[%c3_51, %c0_52] {strides = array<i32: 9, 1>} : memref<18x128xf32, #tpu.memory_space<vmem>>, vector<2x128xf32>
    %c4_53 = arith.constant 4 : index
    %c0_54 = arith.constant 0 : index
    %61 = tpu.strided_load %arg9[%c4_53, %c0_54] {strides = array<i32: 9, 1>} : memref<18x128xf32, #tpu.memory_space<vmem>>, vector<2x128xf32>
    %c5 = arith.constant 5 : index
    %c0_55 = arith.constant 0 : index
    %62 = tpu.strided_load %arg9[%c5, %c0_55] {strides = array<i32: 9, 1>} : memref<18x128xf32, #tpu.memory_space<vmem>>, vector<2x128xf32>
    %c6 = arith.constant 6 : index
    %c0_56 = arith.constant 0 : index
    %63 = tpu.strided_load %arg9[%c6, %c0_56] {strides = array<i32: 9, 1>} : memref<18x128xf32, #tpu.memory_space<vmem>>, vector<2x128xf32>
    %c7 = arith.constant 7 : index
    %c0_57 = arith.constant 0 : index
    %64 = tpu.strided_load %arg9[%c7, %c0_57] {strides = array<i32: 9, 1>} : memref<18x128xf32, #tpu.memory_space<vmem>>, vector<2x128xf32>
    %c8 = arith.constant 8 : index
    %c0_58 = arith.constant 0 : index
    %65 = tpu.strided_load %arg9[%c8, %c0_58] {strides = array<i32: 9, 1>} : memref<18x128xf32, #tpu.memory_space<vmem>>, vector<2x128xf32>
    %66 = tpu.concatenate %57, %58, %59, %60, %61, %62, %63, %64, %65 in 1 : vector<2x128xf32>, vector<2x128xf32>, vector<2x128xf32>, vector<2x128xf32>, vector<2x128xf32>, vector<2x128xf32>, vector<2x128xf32>, vector<2x128xf32>, vector<2x128xf32> -> vector<2x1152xf32>
    %67 = arith.truncf %66 : vector<2x1152xf32> to vector<2x1152xbf16>
    %c0_59 = arith.constant 0 : index
    %c0_60 = arith.constant 0 : index
    %68 = vector.load %arg10[%c0_59, %c0_60] : memref<1152x256xbf16, #tpu.memory_space<vmem>>, vector<1152x256xbf16>
    %cst_61 = arith.constant dense<0.000000e+00> : vector<2x256xf32>
    %69 = tpu.matmul %67, %68, %cst_61 {dimension_numbers = #tpu.dot_dimension_numbers<[1], [0], [0], [1], [0, 0, 1, 1], [], []>} : vector<2x1152xbf16>, vector<1152x256xbf16>, vector<2x256xf32> -> vector<2x256xf32>
    %70 = vector.broadcast %7 : vector<1x256xf32> to vector<2x256xf32>
    %71 = arith.addf %69, %70 : vector<2x256xf32>
    %cst_62 = arith.constant 0.000000e+00 : f32
    %72 = vector.broadcast %cst_62 : f32 to vector<2x256xf32>
    %73 = arith.maximumf %71, %72 : vector<2x256xf32>
    %c1_i32_63 = arith.constant 1 : i32
    %74 = tpu.memref_slice %arg12[%c1_i32_63] : memref<2x!tpu.dma_semaphore, #tpu.memory_space<semaphore_mem>> -> memref<1x!tpu.dma_semaphore, #tpu.memory_space<semaphore_mem>>
    %75 = tpu.memref_squeeze %74 : memref<1x!tpu.dma_semaphore, #tpu.memory_space<semaphore_mem>> -> memref<!tpu.dma_semaphore, #tpu.memory_space<semaphore_mem>>
    tpu.wait_dma2 semaphore(%75 : memref<!tpu.dma_semaphore, #tpu.memory_space<semaphore_mem>>) src(%arg4 : memref<256x128xbf16, #tpu.memory_space<any>>) dst(%arg11 : memref<256x128xbf16, #tpu.memory_space<vmem>>)
    %76 = arith.truncf %73 : vector<2x256xf32> to vector<2x256xbf16>
    %c0_64 = arith.constant 0 : index
    %c0_65 = arith.constant 0 : index
    %77 = vector.load %arg11[%c0_64, %c0_65] : memref<256x128xbf16, #tpu.memory_space<vmem>>, vector<256x128xbf16>
    %cst_66 = arith.constant dense<0.000000e+00> : vector<2x128xf32>
    %78 = tpu.matmul %76, %77, %cst_66 {dimension_numbers = #tpu.dot_dimension_numbers<[1], [0], [0], [1], [0, 0, 1, 1], [], []>} : vector<2x256xbf16>, vector<256x128xbf16>, vector<2x128xf32> -> vector<2x128xf32>
    %79 = vector.broadcast %8 : vector<1x128xf32> to vector<2x128xf32>
    %80 = arith.addf %78, %79 : vector<2x128xf32>
    %cst_67 = arith.constant dense<0xFF800000> : vector<2xf32>
    %81 = vector.multi_reduction <maximumf>, %80, %cst_67 [1] : vector<2x128xf32> to vector<2xf32>
    %82 = vector.shape_cast %81 : vector<2xf32> to vector<2x1xf32>
    %83 = vector.broadcast %82 : vector<2x1xf32> to vector<2x128xf32>
    %84 = arith.subf %80, %83 : vector<2x128xf32>
    %85 = math.exp %84 : vector<2x128xf32>
    %cst_68 = arith.constant dense<0.000000e+00> : vector<2xf32>
    %86 = vector.multi_reduction <add>, %85, %cst_68 [1] : vector<2x128xf32> to vector<2xf32>
    %87 = vector.shape_cast %86 : vector<2xf32> to vector<2x1xf32>
    %88 = tpu.reciprocal %87 {approx = true} : vector<2x1xf32> -> vector<2x1xf32>
    %89 = vector.broadcast %88 : vector<2x1xf32> to vector<2x128xf32>
    %90 = arith.mulf %85, %89 : vector<2x128xf32>
    %c0_69 = arith.constant 0 : index
    %c0_70 = arith.constant 0 : index
    %91 = vector.load %arg5[%c0_69, %c0_70] : memref<2x128xf32, #tpu.memory_space<vmem>>, vector<2x128xf32>
    tpu.vector_store %arg5[%c0_69, %c0_70], %90 {strides = array<i32>} : memref<2x128xf32, #tpu.memory_space<vmem>>, vector<2x128xf32>,
    return
  }
}

</mosaic_0001>

<bundles_post_ra>
// kernel: charcnn_forward.1
= control target key start
LH: loop header
LB: loop body
LE: loop exit
PB: predicated region body
PF: predicated region fallthrough
CT: control target
= control target key end

     0   :  { %10 = vsyncpa [#allocation10], 0  ;;  %s5211_s0 = inlined_call_operand.vmem [shape: bf16[192,448], index: 0, kind: input, shape index: {}]   ;;  %s5212_s1 = inlined_call_operand.vmem [shape: bf16[1088,128], index: 1, kind: input, shape index: {}]   ;;  %s5213_s2 = inlined_call_operand.vmem [shape: f32[4,256], index: 2, kind: input, shape index: {}]   ;;  %s5214_s3 = inlined_call_operand.vmem [shape: bf16[1152,256], index: 3, kind: input, shape index: {}]   ;;  %s5215_s4 = inlined_call_operand.vmem [shape: bf16[256,128], index: 4, kind: input, shape index: {}]   ;;  %s5216_s5 = inlined_call_operand.hbm [shape: f32[2,128], index: 5, kind: output, shape index: {}]  }
   0x1   :  { %v35_v0 = vld [vmem:[%s5214_s3] sm:$0xf]  ;;  %v37_v1 = vld [vmem:[%s5214_s3 + $0x8] sm:$0xf]  ;;  %v39_v2 = vld [vmem:[%s5214_s3 + $0x4] sm:$0xf] }
   0x2   :  { %36 = vst [vmem:[#allocation6] sm:$0xf] %v35_v0  ;;  %38 = vst [vmem:[#allocation6 + $0x4] sm:$0xf] %v37_v1  ;;  %v41_v3 = vld [vmem:[%s5214_s3 + $0xc] sm:$0xff]   ;;  %v49_v6 = vld [vmem:[%s5214_s3 + $0x1c] sm:$0xff]  }
   0x3   :  { %v45_v4 = vld [vmem:[%s5214_s3 + $0x18] sm:$0xf]  ;;  %40 = vst [vmem:[#allocation6 + $0x8] sm:$0xf] %v39_v2  ;;  %42 = vst [vmem:[#allocation6 + $0xc] sm:$0xff] %v41_v3   ;;  %v57_v9 = vld [vmem:[%s5214_s3 + $0x2c] sm:$0xff]  }
   0x4   :  { %46 = vst [vmem:[#allocation6 + $0x14] sm:$0xf] %v45_v4  ;;  %v47_v5 = vld [vmem:[%s5214_s3 + $0x14] sm:$0xf]  ;;  %v53_v7 = vld [vmem:[%s5214_s3 + $0x28] sm:$0xf] }
   0x5   :  { %48 = vst [vmem:[#allocation6 + $0x18] sm:$0xf] %v47_v5  ;;  %50 = vst [vmem:[#allocation6 + $0x1c] sm:$0xff] %v49_v6   ;;  %v55_v8 = vld [vmem:[%s5214_s3 + $0x24] sm:$0xf]  ;;  %v65_v12 = vld [vmem:[%s5214_s3 + $0x3c] sm:$0xff]  }
   0x6   :  { %54 = vst [vmem:[#allocation6 + $0x24] sm:$0xf] %v53_v7  ;;  %v61_v10 = vld [vmem:[%s5214_s3 + $0x38] sm:$0xf]  ;;  %56 = vst [vmem:[#allocation6 + $0x28] sm:$0xf] %v55_v8 }
   0x7   :  { %58 = vst [vmem:[#allocation6 + $0x2c] sm:$0xff] %v57_v9   ;;  %62 = vst [vmem:[#allocation6 + $0x34] sm:$0xf] %v61_v10  ;;  %v63_v11 = vld [vmem:[%s5214_s3 + $0x34] sm:$0xf]  ;;  %v73_v15 = vld [vmem:[%s5214_s3 + $0x4c] sm:$0xff]  }
   0x8   :  { %v69_v13 = vld [vmem:[%s5214_s3 + $0x48] sm:$0xf]  ;;  %64 = vst [vmem:[#allocation6 + $0x38] sm:$0xf] %v63_v11  ;;  %66 = vst [vmem:[#allocation6 + $0x3c] sm:$0xff] %v65_v12   ;;  %v81_v18 = vld [vmem:[%s5214_s3 + $0x5c] sm:$0xff]  }
   0x9   :  { %70 = vst [vmem:[#allocation6 + $0x44] sm:$0xf] %v69_v13  ;;  %v71_v14 = vld [vmem:[%s5214_s3 + $0x44] sm:$0xf]  ;;  %v77_v16 = vld [vmem:[%s5214_s3 + $0x58] sm:$0xf] }
   0xa   :  { %72 = vst [vmem:[#allocation6 + $0x48] sm:$0xf] %v71_v14  ;;  %74 = vst [vmem:[#allocation6 + $0x4c] sm:$0xff] %v73_v15   ;;  %v79_v17 = vld [vmem:[%s5214_s3 + $0x54] sm:$0xf]  ;;  %v89_v21 = vld [vmem:[%s5214_s3 + $0x6c] sm:$0xff]  }
   0xb   :  { %78 = vst [vmem:[#allocation6 + $0x54] sm:$0xf] %v77_v16  ;;  %v85_v19 = vld [vmem:[%s5214_s3 + $0x68] sm:$0xf]  ;;  %80 = vst [vmem:[#allocation6 + $0x58] sm:$0xf] %v79_v17 }
   0xc   :  { %82 = vst [vmem:[#allocation6 + $0x5c] sm:$0xff] %v81_v18   ;;  %86 = vst [vmem:[#allocation6 + $0x64] sm:$0xf] %v85_v19  ;;  %v87_v20 = vld [vmem:[%s5214_s3 + $0x64] sm:$0xf]  ;;  %v97_v24 = vld [vmem:[%s5214_s3 + $0x7c] sm:$0xff]  }
   0xd   :  { %v93_v22 = vld [vmem:[%s5214_s3 + $0x78] sm:$0xf]  ;;  %88 = vst [vmem:[#allocation6 + $0x68] sm:$0xf] %v87_v20  ;;  %90 = vst [vmem:[#allocation6 + $0x6c] sm:$0xff] %v89_v21   ;;  %v105_v27 = vld [vmem:[%s5214_s3 + $0x8c] sm:$0xff]  }
   0xe   :  { %94 = vst [vmem:[#allocation6 + $0x74] sm:$0xf] %v93_v22  ;;  %v95_v23 = vld [vmem:[%s5214_s3 + $0x74] sm:$0xf]  ;;  %v101_v25 = vld [vmem:[%s5214_s3 + $0x88] sm:$0xf] }
   0xf   :  { %96 = vst [vmem:[#allocation6 + $0x78] sm:$0xf] %v95_v23  ;;  %98 = vst [vmem:[#allocation6 + $0x7c] sm:$0xff] %v97_v24   ;;  %v103_v26 = vld [vmem:[%s5214_s3 + $0x84] sm:$0xf]  ;;  %v113_v30 = vld [vmem:[%s5214_s3 + $0x9c] sm:$0xff]  }
  0x10   :  { %102 = vst [vmem:[#allocation6 + $0x84] sm:$0xf] %v101_v25  ;;  %v109_v28 = vld [vmem:[%s5214_s3 + $0x98] sm:$0xf]  ;;  %104 = vst [vmem:[#allocation6 + $0x88] sm:$0xf] %v103_v26 }
  0x11   :  { %106 = vst [vmem:[#allocation6 + $0x8c] sm:$0xff] %v105_v27   ;;  %110 = vst [vmem:[#allocation6 + $0x94] sm:$0xf] %v109_v28  ;;  %v111_v29 = vld [vmem:[%s5214_s3 + $0x94] sm:$0xf]  ;;  %v121_v33 = vld [vmem:[%s5214_s3 + $0xac] sm:$0xff]  }
  0x12   :  { %v117_v31 = vld [vmem:[%s5214_s3 + $0xa8] sm:$0xf]  ;;  %112 = vst [vmem:[#allocation6 + $0x98] sm:$0xf] %v111_v29  ;;  %114 = vst [vmem:[#allocation6 + $0x9c] sm:$0xff] %v113_v30   ;;  %v129_v36 = vld [vmem:[%s5214_s3 + $0xbc] sm:$0xff]  }
  0x13   :  { %118 = vst [vmem:[#allocation6 + $0xa4] sm:$0xf] %v117_v31  ;;  %v119_v32 = vld [vmem:[%s5214_s3 + $0xa4] sm:$0xf]  ;;  %v125_v34 = vld [vmem:[%s5214_s3 + $0xb8] sm:$0xf] }
  0x14   :  { %120 = vst [vmem:[#allocation6 + $0xa8] sm:$0xf] %v119_v32  ;;  %122 = vst [vmem:[#allocation6 + $0xac] sm:$0xff] %v121_v33   ;;  %v127_v35 = vld [vmem:[%s5214_s3 + $0xb4] sm:$0xf]  ;;  %v137_v39 = vld [vmem:[%s5214_s3 + $0xcc] sm:$0xff]  }
  0x15   :  { %126 = vst [vmem:[#allocation6 + $0xb4] sm:$0xf] %v125_v34  ;;  %v133_v37 = vld [vmem:[%s5214_s3 + $0xc8] sm:$0xf]  ;;  %128 = vst [vmem:[#allocation6 + $0xb8] sm:$0xf] %v127_v35 }
  0x16   :  { %130 = vst [vmem:[#allocation6 + $0xbc] sm:$0xff] %v129_v36   ;;  %134 = vst [vmem:[#allocation6 + $0xc4] sm:$0xf] %v133_v37  ;;  %v135_v38 = vld [vmem:[%s5214_s3 + $0xc4] sm:$0xf]  ;;  %v145_v42 = vld [vmem:[%s5214_s3 + $0xdc] sm:$0xff]  }
  0x17   :  { %v141_v40 = vld [vmem:[%s5214_s3 + $0xd8] sm:$0xf]  ;;  %136 = vst [vmem:[#allocation6 + $0xc8] sm:$0xf] %v135_v38  ;;  %138 = vst [vmem:[#allocation6 + $0xcc] sm:$0xff] %v137_v39   ;;  %v153_v45 = vld [vmem:[%s5214_s3 + $0xec] sm:$0xff]  }
  0x18   :  { %142 = vst [vmem:[#allocation6 + $0xd4] sm:$0xf] %v141_v40  ;;  %v143_v41 = vld [vmem:[%s5214_s3 + $0xd4] sm:$0xf]  ;;  %v149_v43 = vld [vmem:[%s5214_s3 + $0xe8] sm:$0xf] }
  0x19   :  { %144 = vst [vmem:[#allocation6 + $0xd8] sm:$0xf] %v143_v41  ;;  %146 = vst [vmem:[#allocation6 + $0xdc] sm:$0xff] %v145_v42   ;;  %v151_v44 = vld [vmem:[%s5214_s3 + $0xe4] sm:$0xf]  ;;  %v161_v48 = vld [vmem:[%s5214_s3 + $0xfc] sm:$0xff]  }
  0x1a   :  { %150 = vst [vmem:[#allocation6 + $0xe4] sm:$0xf] %v149_v43  ;;  %v157_v46 = vld [vmem:[%s5214_s3 + $0xf8] sm:$0xf]  ;;  %152 = vst [vmem:[#allocation6 + $0xe8] sm:$0xf] %v151_v44 }
  0x1b   :  { %154 = vst [vmem:[#allocation6 + $0xec] sm:$0xff] %v153_v45   ;;  %158 = vst [vmem:[#allocation6 + $0xf4] sm:$0xf] %v157_v46  ;;  %v159_v47 = vld [vmem:[%s5214_s3 + $0xf4] sm:$0xf]  ;;  %v169_v51 = vld [vmem:[%s5214_s3 + $0x10c] sm:$0xff]  }
  0x1c   :  { %v165_v49 = vld [vmem:[%s5214_s3 + $0x108] sm:$0xf]  ;;  %160 = vst [vmem:[#allocation6 + $0xf8] sm:$0xf] %v159_v47  ;;  %162 = vst [vmem:[#allocation6 + $0xfc] sm:$0xff] %v161_v48   ;;  %v177_v54 = vld [vmem:[%s5214_s3 + $0x11c] sm:$0xff]  }
  0x1d   :  { %166 = vst [vmem:[#allocation6 + $0x104] sm:$0xf] %v165_v49  ;;  %v167_v50 = vld [vmem:[%s5214_s3 + $0x104] sm:$0xf]  ;;  %v173_v52 = vld [vmem:[%s5214_s3 + $0x118] sm:$0xf] }
  0x1e   :  { %168 = vst [vmem:[#allocation6 + $0x108] sm:$0xf] %v167_v50  ;;  %170 = vst [vmem:[#allocation6 + $0x10c] sm:$0xff] %v169_v51   ;;  %v175_v53 = vld [vmem:[%s5214_s3 + $0x114] sm:$0xf]  ;;  %v185_v57 = vld [vmem:[%s5214_s3 + $0x12c] sm:$0xff]  }
  0x1f   :  { %174 = vst [vmem:[#allocation6 + $0x114] sm:$0xf] %v173_v52  ;;  %v181_v55 = vld [vmem:[%s5214_s3 + $0x128] sm:$0xf]  ;;  %176 = vst [vmem:[#allocation6 + $0x118] sm:$0xf] %v175_v53 }
  0x20   :  { %178 = vst [vmem:[#allocation6 + $0x11c] sm:$0xff] %v177_v54   ;;  %182 = vst [vmem:[#allocation6 + $0x124] sm:$0xf] %v181_v55  ;;  %v183_v56 = vld [vmem:[%s5214_s3 + $0x124] sm:$0xf]  ;;  %v193_v60 = vld [vmem:[%s5214_s3 + $0x13c] sm:$0xff]  }
  0x21   :  { %v189_v58 = vld [vmem:[%s5214_s3 + $0x138] sm:$0xf]  ;;  %184 = vst [vmem:[#allocation6 + $0x128] sm:$0xf] %v183_v56  ;;  %186 = vst [vmem:[#allocation6 + $0x12c] sm:$0xff] %v185_v57   ;;  %v201_v63 = vld [vmem:[%s5214_s3 + $0x14c] sm:$0xff]  }
  0x22   :  { %190 = vst [vmem:[#allocation6 + $0x134] sm:$0xf] %v189_v58  ;;  %v191_v59 = vld [vmem:[%s5214_s3 + $0x134] sm:$0xf]  ;;  %v197_v61 = vld [vmem:[%s5214_s3 + $0x148] sm:$0xf] }
  0x23   :  { %192 = vst [vmem:[#allocation6 + $0x138] sm:$0xf] %v191_v59  ;;  %194 = vst [vmem:[#allocation6 + $0x13c] sm:$0xff] %v193_v60   ;;  %v199_v62 = vld [vmem:[%s5214_s3 + $0x144] sm:$0xf]  ;;  %v209_v2 = vld [vmem:[%s5214_s3 + $0x15c] sm:$0xff]  }
  0x24   :  { %198 = vst [vmem:[#allocation6 + $0x144] sm:$0xf] %v197_v61  ;;  %v205_v0 = vld [vmem:[%s5214_s3 + $0x158] sm:$0xf]  ;;  %200 = vst [vmem:[#allocation6 + $0x148] sm:$0xf] %v199_v62 }
  0x25   :  { %202 = vst [vmem:[#allocation6 + $0x14c] sm:$0xff] %v201_v63   ;;  %206 = vst [vmem:[#allocation6 + $0x154] sm:$0xf] %v205_v0  ;;  %v207_v1 = vld [vmem:[%s5214_s3 + $0x154] sm:$0xf]  ;;  %v217_v5 = vld [vmem:[%s5214_s3 + $0x16c] sm:$0xff]  }
  0x26   :  { %v213_v3 = vld [vmem:[%s5214_s3 + $0x168] sm:$0xf]  ;;  %208 = vst [vmem:[#allocation6 + $0x158] sm:$0xf] %v207_v1  ;;  %210 = vst [vmem:[#allocation6 + $0x15c] sm:$0xff] %v209_v2   ;;  %v225_v8 = vld [vmem:[%s5214_s3 + $0x17c] sm:$0xff]  }
  0x27   :  { %214 = vst [vmem:[#allocation6 + $0x164] sm:$0xf] %v213_v3  ;;  %v215_v4 = vld [vmem:[%s5214_s3 + $0x164] sm:$0xf]  ;;  %v221_v6 = vld [vmem:[%s5214_s3 + $0x178] sm:$0xf] }
  0x28   :  { %216 = vst [vmem:[#allocation6 + $0x168] sm:$0xf] %v215_v4  ;;  %218 = vst [vmem:[#allocation6 + $0x16c] sm:$0xff] %v217_v5   ;;  %v223_v7 = vld [vmem:[%s5214_s3 + $0x174] sm:$0xf]  ;;  %v233_v11 = vld [vmem:[%s5214_s3 + $0x18c] sm:$0xff]  }
  0x29   :  { %222 = vst [vmem:[#allocation6 + $0x174] sm:$0xf] %v221_v6  ;;  %v229_v9 = vld [vmem:[%s5214_s3 + $0x188] sm:$0xf]  ;;  %224 = vst [vmem:[#allocation6 + $0x178] sm:$0xf] %v223_v7 }
  0x2a   :  { %226 = vst [vmem:[#allocation6 + $0x17c] sm:$0xff] %v225_v8   ;;  %230 = vst [vmem:[#allocation6 + $0x184] sm:$0xf] %v229_v9  ;;  %v231_v10 = vld [vmem:[%s5214_s3 + $0x184] sm:$0xf]  ;;  %v241_v14 = vld [vmem:[%s5214_s3 + $0x19c] sm:$0xff]  }
  0x2b   :  { %v237_v12 = vld [vmem:[%s5214_s3 + $0x198] sm:$0xf]  ;;  %232 = vst [vmem:[#allocation6 + $0x188] sm:$0xf] %v231_v10  ;;  %234 = vst [vmem:[#allocation6 + $0x18c] sm:$0xff] %v233_v11   ;;  %v249_v17 = vld [vmem:[%s5214_s3 + $0x1ac] sm:$0xff]  }
  0x2c   :  { %238 = vst [vmem:[#allocation6 + $0x194] sm:$0xf] %v237_v12  ;;  %v239_v13 = vld [vmem:[%s5214_s3 + $0x194] sm:$0xf]  ;;  %v245_v15 = vld [vmem:[%s5214_s3 + $0x1a8] sm:$0xf] }
  0x2d   :  { %240 = vst [vmem:[#allocation6 + $0x198] sm:$0xf] %v239_v13  ;;  %242 = vst [vmem:[#allocation6 + $0x19c] sm:$0xff] %v241_v14   ;;  %v247_v16 = vld [vmem:[%s5214_s3 + $0x1a4] sm:$0xf]  ;;  %v257_v20 = vld [vmem:[%s5214_s3 + $0x1bc] sm:$0xff]  }
  0x2e   :  { %246 = vst [vmem:[#allocation6 + $0x1a4] sm:$0xf] %v245_v15  ;;  %v253_v18 = vld [vmem:[%s5214_s3 + $0x1b8] sm:$0xf]  ;;  %248 = vst [vmem:[#allocation6 + $0x1a8] sm:$0xf] %v247_v16 }
  0x2f   :  { %250 = vst [vmem:[#allocation6 + $0x1ac] sm:$0xff] %v249_v17   ;;  %254 = vst [vmem:[#allocation6 + $0x1b4] sm:$0xf] %v253_v18  ;;  %v255_v19 = vld [vmem:[%s5214_s3 + $0x1b4] sm:$0xf]  ;;  %v265_v23 = vld [vmem:[%s5214_s3 + $0x1cc] sm:$0xff]  }
  0x30   :  { %v261_v21 = vld [vmem:[%s5214_s3 + $0x1c8] sm:$0xf]  ;;  %256 = vst [vmem:[#allocation6 + $0x1b8] sm:$0xf] %v255_v19  ;;  %258 = vst [vmem:[#allocation6 + $0x1bc] sm:$0xff] %v257_v20   ;;  %v273_v26 = vld [vmem:[%s5214_s3 + $0x1dc] sm:$0xff]  }
  0x31   :  { %262 = vst [vmem:[#allocation6 + $0x1c4] sm:$0xf] %v261_v21  ;;  %v263_v22 = vld [vmem:[%s5214_s3 + $0x1c4] sm:$0xf]  ;;  %v269_v24 = vld [vmem:[%s5214_s3 + $0x1d8] sm:$0xf] }
  0x32   :  { %264 = vst [vmem:[#allocation6 + $0x1c8] sm:$0xf] %v263_v22  ;;  %266 = vst [vmem:[#allocation6 + $0x1cc] sm:$0xff] %v265_v23   ;;  %v271_v25 = vld [vmem:[%s5214_s3 + $0x1d4] sm:$0xf]  ;;  %v281_v29 = vld [vmem:[%s5214_s3 + $0x1ec] sm:$0xff]  }
  0x33   :  { %270 = vst [vmem:[#allocation6 + $0x1d4] sm:$0xf] %v269_v24  ;;  %v277_v27 = vld [vmem:[%s5214_s3 + $0x1e8] sm:$0xf]  ;;  %272 = vst [vmem:[#allocation6 + $0x1d8] sm:$0xf] %v271_v25 }
  0x34   :  { %274 = vst [vmem:[#allocation6 + $0x1dc] sm:$0xff] %v273_v26   ;;  %278 = vst [vmem:[#allocation6 + $0x1e4] sm:$0xf] %v277_v27  ;;  %v279_v28 = vld [vmem:[%s5214_s3 + $0x1e4] sm:$0xf]  ;;  %v289_v32 = vld [vmem:[%s5214_s3 + $0x1fc] sm:$0xff]  }
  0x35   :  { %v285_v30 = vld [vmem:[%s5214_s3 + $0x1f8] sm:$0xf]  ;;  %280 = vst [vmem:[#allocation6 + $0x1e8] sm:$0xf] %v279_v28  ;;  %282 = vst [vmem:[#allocation6 + $0x1ec] sm:$0xff] %v281_v29   ;;  %v297_v35 = vld [vmem:[%s5214_s3 + $0x20c] sm:$0xff]  }
  0x36   :  { %286 = vst [vmem:[#allocation6 + $0x1f4] sm:$0xf] %v285_v30  ;;  %v287_v31 = vld [vmem:[%s5214_s3 + $0x1f4] sm:$0xf]  ;;  %v293_v33 = vld [vmem:[%s5214_s3 + $0x208] sm:$0xf] }
  0x37   :  { %288 = vst [vmem:[#allocation6 + $0x1f8] sm:$0xf] %v287_v31  ;;  %290 = vst [vmem:[#allocation6 + $0x1fc] sm:$0xff] %v289_v32   ;;  %v295_v34 = vld [vmem:[%s5214_s3 + $0x204] sm:$0xf]  ;;  %v305_v38 = vld [vmem:[%s5214_s3 + $0x21c] sm:$0xff]  }
  0x38   :  { %294 = vst [vmem:[#allocation6 + $0x204] sm:$0xf] %v293_v33  ;;  %v301_v36 = vld [vmem:[%s5214_s3 + $0x218] sm:$0xf]  ;;  %296 = vst [vmem:[#allocation6 + $0x208] sm:$0xf] %v295_v34 }
  0x39   :  { %298 = vst [vmem:[#allocation6 + $0x20c] sm:$0xff] %v297_v35   ;;  %302 = vst [vmem:[#allocation6 + $0x214] sm:$0xf] %v301_v36  ;;  %v303_v37 = vld [vmem:[%s5214_s3 + $0x214] sm:$0xf]  ;;  %v313_v41 = vld [vmem:[%s5214_s3 + $0x22c] sm:$0xff]  }
  0x3a   :  { %v309_v39 = vld [vmem:[%s5214_s3 + $0x228] sm:$0xf]  ;;  %304 = vst [vmem:[#allocation6 + $0x218] sm:$0xf] %v303_v37  ;;  %306 = vst [vmem:[#allocation6 + $0x21c] sm:$0xff] %v305_v38   ;;  %v321_v44 = vld [vmem:[%s5214_s3 + $0x23c] sm:$0xff]  }
  0x3b   :  { %310 = vst [vmem:[#allocation6 + $0x224] sm:$0xf] %v309_v39  ;;  %v311_v40 = vld [vmem:[%s5214_s3 + $0x224] sm:$0xf]  ;;  %v317_v42 = vld [vmem:[%s5214_s3 + $0x238] sm:$0xf] }
  0x3c   :  { %312 = vst [vmem:[#allocation6 + $0x228] sm:$0xf] %v311_v40  ;;  %314 = vst [vmem:[#allocation6 + $0x22c] sm:$0xff] %v313_v41   ;;  %v319_v43 = vld [vmem:[%s5214_s3 + $0x234] sm:$0xf]  ;;  %v329_v47 = vld [vmem:[%s5214_s3 + $0x24c] sm:$0xff]  }
  0x3d   :  { %318 = vst [vmem:[#allocation6 + $0x234] sm:$0xf] %v317_v42  ;;  %v325_v45 = vld [vmem:[%s5214_s3 + $0x248] sm:$0xf]  ;;  %320 = vst [vmem:[#allocation6 + $0x238] sm:$0xf] %v319_v43 }
  0x3e   :  { %322 = vst [vmem:[#allocation6 + $0x23c] sm:$0xff] %v321_v44   ;;  %326 = vst [vmem:[#allocation6 + $0x244] sm:$0xf] %v325_v45  ;;  %v327_v46 = vld [vmem:[%s5214_s3 + $0x244] sm:$0xf]  ;;  %v337_v50 = vld [vmem:[%s5214_s3 + $0x25c] sm:$0xff]  }
  0x3f   :  { %v333_v48 = vld [vmem:[%s5214_s3 + $0x258] sm:$0xf]  ;;  %328 = vst [vmem:[#allocation6 + $0x248] sm:$0xf] %v327_v46  ;;  %330 = vst [vmem:[#allocation6 + $0x24c] sm:$0xff] %v329_v47   ;;  %v345_v53 = vld [vmem:[%s5214_s3 + $0x26c] sm:$0xff]  }
  0x40   :  { %334 = vst [vmem:[#allocation6 + $0x254] sm:$0xf] %v333_v48  ;;  %v335_v49 = vld [vmem:[%s5214_s3 + $0x254] sm:$0xf]  ;;  %v341_v51 = vld [vmem:[%s5214_s3 + $0x268] sm:$0xf] }
  0x41   :  { %336 = vst [vmem:[#allocation6 + $0x258] sm:$0xf] %v335_v49  ;;  %338 = vst [vmem:[#allocation6 + $0x25c] sm:$0xff] %v337_v50   ;;  %v343_v52 = vld [vmem:[%s5214_s3 + $0x264] sm:$0xf]  ;;  %v353_v56 = vld [vmem:[%s5214_s3 + $0x27c] sm:$0xff]  }
  0x42   :  { %342 = vst [vmem:[#allocation6 + $0x264] sm:$0xf] %v341_v51  ;;  %v349_v54 = vld [vmem:[%s5214_s3 + $0x278] sm:$0xf]  ;;  %344 = vst [vmem:[#allocation6 + $0x268] sm:$0xf] %v343_v52 }
  0x43   :  { %346 = vst [vmem:[#allocation6 + $0x26c] sm:$0xff] %v345_v53   ;;  %350 = vst [vmem:[#allocation6 + $0x274] sm:$0xf] %v349_v54  ;;  %v351_v55 = vld [vmem:[%s5214_s3 + $0x274] sm:$0xf]  ;;  %v361_v59 = vld [vmem:[%s5214_s3 + $0x28c] sm:$0xff]  }
  0x44   :  { %v357_v57 = vld [vmem:[%s5214_s3 + $0x288] sm:$0xf]  ;;  %352 = vst [vmem:[#allocation6 + $0x278] sm:$0xf] %v351_v55  ;;  %354 = vst [vmem:[#allocation6 + $0x27c] sm:$0xff] %v353_v56   ;;  %v369_v62 = vld [vmem:[%s5214_s3 + $0x29c] sm:$0xff]  }
  0x45   :  { %358 = vst [vmem:[#allocation6 + $0x284] sm:$0xf] %v357_v57  ;;  %v359_v58 = vld [vmem:[%s5214_s3 + $0x284] sm:$0xf]  ;;  %v365_v60 = vld [vmem:[%s5214_s3 + $0x298] sm:$0xf] }
  0x46   :  { %360 = vst [vmem:[#allocation6 + $0x288] sm:$0xf] %v359_v58  ;;  %362 = vst [vmem:[#allocation6 + $0x28c] sm:$0xff] %v361_v59   ;;  %v367_v61 = vld [vmem:[%s5214_s3 + $0x294] sm:$0xf]  ;;  %v377_v1 = vld [vmem:[%s5214_s3 + $0x2ac] sm:$0xff]  }
  0x47   :  { %366 = vst [vmem:[#allocation6 + $0x294] sm:$0xf] %v365_v60  ;;  %v373_v63 = vld [vmem:[%s5214_s3 + $0x2a8] sm:$0xf]  ;;  %368 = vst [vmem:[#allocation6 + $0x298] sm:$0xf] %v367_v61 }
  0x48   :  { %370 = vst [vmem:[#allocation6 + $0x29c] sm:$0xff] %v369_v62   ;;  %374 = vst [vmem:[#allocation6 + $0x2a4] sm:$0xf] %v373_v63  ;;  %v375_v0 = vld [vmem:[%s5214_s3 + $0x2a4] sm:$0xf]  ;;  %v385_v4 = vld [vmem:[%s5214_s3 + $0x2bc] sm:$0xff]  }
  0x49   :  { %v381_v2 = vld [vmem:[%s5214_s3 + $0x2b8] sm:$0xf]  ;;  %376 = vst [vmem:[#allocation6 + $0x2a8] sm:$0xf] %v375_v0  ;;  %378 = vst [vmem:[#allocation6 + $0x2ac] sm:$0xff] %v377_v1   ;;  %v393_v7 = vld [vmem:[%s5214_s3 + $0x2cc] sm:$0xff]  }
  0x4a   :  { %382 = vst [vmem:[#allocation6 + $0x2b4] sm:$0xf] %v381_v2  ;;  %v383_v3 = vld [vmem:[%s5214_s3 + $0x2b4] sm:$0xf]  ;;  %v389_v5 = vld [vmem:[%s5214_s3 + $0x2c8] sm:$0xf] }
  0x4b   :  { %384 = vst [vmem:[#allocation6 + $0x2b8] sm:$0xf] %v383_v3  ;;  %386 = vst [vmem:[#allocation6 + $0x2bc] sm:$0xff] %v385_v4   ;;  %v391_v6 = vld [vmem:[%s5214_s3 + $0x2c4] sm:$0xf]  ;;  %v401_v10 = vld [vmem:[%s5214_s3 + $0x2dc] sm:$0xff]  }
  0x4c   :  { %390 = vst [vmem:[#allocation6 + $0x2c4] sm:$0xf] %v389_v5  ;;  %v397_v8 = vld [vmem:[%s5214_s3 + $0x2d8] sm:$0xf]  ;;  %392 = vst [vmem:[#allocation6 + $0x2c8] sm:$0xf] %v391_v6 }
  0x4d   :  { %394 = vst [vmem:[#allocation6 + $0x2cc] sm:$0xff] %v393_v7   ;;  %398 = vst [vmem:[#allocation6 + $0x2d4] sm:$0xf] %v397_v8  ;;  %v399_v9 = vld [vmem:[%s5214_s3 + $0x2d4] sm:$0xf]  ;;  %v409_v13 = vld [vmem:[%s5214_s3 + $0x2ec] sm:$0xff]  }
  0x4e   :  { %v405_v11 = vld [vmem:[%s5214_s3 + $0x2e8] sm:$0xf]  ;;  %400 = vst [vmem:[#allocation6 + $0x2d8] sm:$0xf] %v399_v9  ;;  %402 = vst [vmem:[#allocation6 + $0x2dc] sm:$0xff] %v401_v10   ;;  %v417_v16 = vld [vmem:[%s5214_s3 + $0x2fc] sm:$0xff]  }
  0x4f   :  { %406 = vst [vmem:[#allocation6 + $0x2e4] sm:$0xf] %v405_v11  ;;  %v407_v12 = vld [vmem:[%s5214_s3 + $0x2e4] sm:$0xf]  ;;  %v413_v14 = vld [vmem:[%s5214_s3 + $0x2f8] sm:$0xf] }
  0x50   :  { %408 = vst [vmem:[#allocation6 + $0x2e8] sm:$0xf] %v407_v12  ;;  %410 = vst [vmem:[#allocation6 + $0x2ec] sm:$0xff] %v409_v13   ;;  %v415_v15 = vld [vmem:[%s5214_s3 + $0x2f4] sm:$0xf]  ;;  %v425_v19 = vld [vmem:[%s5214_s3 + $0x30c] sm:$0xff]  }
  0x51   :  { %414 = vst [vmem:[#allocation6 + $0x2f4] sm:$0xf] %v413_v14  ;;  %v421_v17 = vld [vmem:[%s5214_s3 + $0x308] sm:$0xf]  ;;  %416 = vst [vmem:[#allocation6 + $0x2f8] sm:$0xf] %v415_v15 }
  0x52   :  { %418 = vst [vmem:[#allocation6 + $0x2fc] sm:$0xff] %v417_v16   ;;  %422 = vst [vmem:[#allocation6 + $0x304] sm:$0xf] %v421_v17  ;;  %v423_v18 = vld [vmem:[%s5214_s3 + $0x304] sm:$0xf]  ;;  %v433_v22 = vld [vmem:[%s5214_s3 + $0x31c] sm:$0xff]  }
  0x53   :  { %v429_v20 = vld [vmem:[%s5214_s3 + $0x318] sm:$0xf]  ;;  %424 = vst [vmem:[#allocation6 + $0x308] sm:$0xf] %v423_v18  ;;  %426 = vst [vmem:[#allocation6 + $0x30c] sm:$0xff] %v425_v19   ;;  %v441_v25 = vld [vmem:[%s5214_s3 + $0x32c] sm:$0xff]  }
  0x54   :  { %430 = vst [vmem:[#allocation6 + $0x314] sm:$0xf] %v429_v20  ;;  %v431_v21 = vld [vmem:[%s5214_s3 + $0x314] sm:$0xf]  ;;  %v437_v23 = vld [vmem:[%s5214_s3 + $0x328] sm:$0xf] }
  0x55   :  { %432 = vst [vmem:[#allocation6 + $0x318] sm:$0xf] %v431_v21  ;;  %434 = vst [vmem:[#allocation6 + $0x31c] sm:$0xff] %v433_v22   ;;  %v439_v24 = vld [vmem:[%s5214_s3 + $0x324] sm:$0xf]  ;;  %v449_v28 = vld [vmem:[%s5214_s3 + $0x33c] sm:$0xff]  }
  0x56   :  { %438 = vst [vmem:[#allocation6 + $0x324] sm:$0xf] %v437_v23  ;;  %v445_v26 = vld [vmem:[%s5214_s3 + $0x338] sm:$0xf]  ;;  %440 = vst [vmem:[#allocation6 + $0x328] sm:$0xf] %v439_v24 }
  0x57   :  { %442 = vst [vmem:[#allocation6 + $0x32c] sm:$0xff] %v441_v25   ;;  %446 = vst [vmem:[#allocation6 + $0x334] sm:$0xf] %v445_v26  ;;  %v447_v27 = vld [vmem:[%s5214_s3 + $0x334] sm:$0xf]  ;;  %v457_v31 = vld [vmem:[%s5214_s3 + $0x34c] sm:$0xff]  }
  0x58   :  { %v453_v29 = vld [vmem:[%s5214_s3 + $0x348] sm:$0xf]  ;;  %448 = vst [vmem:[#allocation6 + $0x338] sm:$0xf] %v447_v27  ;;  %450 = vst [vmem:[#allocation6 + $0x33c] sm:$0xff] %v449_v28   ;;  %v465_v34 = vld [vmem:[%s5214_s3 + $0x35c] sm:$0xff]  }
  0x59   :  { %454 = vst [vmem:[#allocation6 + $0x344] sm:$0xf] %v453_v29  ;;  %v455_v30 = vld [vmem:[%s5214_s3 + $0x344] sm:$0xf]  ;;  %v461_v32 = vld [vmem:[%s5214_s3 + $0x358] sm:$0xf] }
  0x5a   :  { %456 = vst [vmem:[#allocation6 + $0x348] sm:$0xf] %v455_v30  ;;  %458 = vst [vmem:[#allocation6 + $0x34c] sm:$0xff] %v457_v31   ;;  %v463_v33 = vld [vmem:[%s5214_s3 + $0x354] sm:$0xf]  ;;  %v473_v37 = vld [vmem:[%s5214_s3 + $0x36c] sm:$0xff]  }
  0x5b   :  { %462 = vst [vmem:[#allocation6 + $0x354] sm:$0xf] %v461_v32  ;;  %v469_v35 = vld [vmem:[%s5214_s3 + $0x368] sm:$0xf]  ;;  %464 = vst [vmem:[#allocation6 + $0x358] sm:$0xf] %v463_v33 }
  0x5c   :  { %466 = vst [vmem:[#allocation6 + $0x35c] sm:$0xff] %v465_v34   ;;  %470 = vst [vmem:[#allocation6 + $0x364] sm:$0xf] %v469_v35  ;;  %v471_v36 = vld [vmem:[%s5214_s3 + $0x364] sm:$0xf]  ;;  %v481_v40 = vld [vmem:[%s5214_s3 + $0x37c] sm:$0xff]  }
  0x5d   :  { %v477_v38 = vld [vmem:[%s5214_s3 + $0x378] sm:$0xf]  ;;  %472 = vst [vmem:[#allocation6 + $0x368] sm:$0xf] %v471_v36  ;;  %474 = vst [vmem:[#allocation6 + $0x36c] sm:$0xff] %v473_v37   ;;  %v489_v43 = vld [vmem:[%s5214_s3 + $0x38c] sm:$0xff]  }
  0x5e   :  { %478 = vst [vmem:[#allocation6 + $0x374] sm:$0xf] %v477_v38  ;;  %v479_v39 = vld [vmem:[%s5214_s3 + $0x374] sm:$0xf]  ;;  %v485_v41 = vld [vmem:[%s5214_s3 + $0x388] sm:$0xf] }
  0x5f   :  { %480 = vst [vmem:[#allocation6 + $0x378] sm:$0xf] %v479_v39  ;;  %482 = vst [vmem:[#allocation6 + $0x37c] sm:$0xff] %v481_v40   ;;  %v487_v42 = vld [vmem:[%s5214_s3 + $0x384] sm:$0xf]  ;;  %v497_v46 = vld [vmem:[%s5214_s3 + $0x39c] sm:$0xff]  }
  0x60   :  { %486 = vst [vmem:[#allocation6 + $0x384] sm:$0xf] %v485_v41  ;;  %v493_v44 = vld [vmem:[%s5214_s3 + $0x398] sm:$0xf]  ;;  %488 = vst [vmem:[#allocation6 + $0x388] sm:$0xf] %v487_v42 }
  0x61   :  { %490 = vst [vmem:[#allocation6 + $0x38c] sm:$0xff] %v489_v43   ;;  %494 = vst [vmem:[#allocation6 + $0x394] sm:$0xf] %v493_v44  ;;  %v495_v45 = vld [vmem:[%s5214_s3 + $0x394] sm:$0xf]  ;;  %v505_v49 = vld [vmem:[%s5214_s3 + $0x3ac] sm:$0xff]  }
  0x62   :  { %v501_v47 = vld [vmem:[%s5214_s3 + $0x3a8] sm:$0xf]  ;;  %496 = vst [vmem:[#allocation6 + $0x398] sm:$0xf] %v495_v45  ;;  %498 = vst [vmem:[#allocation6 + $0x39c] sm:$0xff] %v497_v46   ;;  %v513_v52 = vld [vmem:[%s5214_s3 + $0x3bc] sm:$0xff]  }
  0x63   :  { %502 = vst [vmem:[#allocation6 + $0x3a4] sm:$0xf] %v501_v47  ;;  %v503_v48 = vld [vmem:[%s5214_s3 + $0x3a4] sm:$0xf]  ;;  %v509_v50 = vld [vmem:[%s5214_s3 + $0x3b8] sm:$0xf] }
  0x64   :  { %504 = vst [vmem:[#allocation6 + $0x3a8] sm:$0xf] %v503_v48  ;;  %506 = vst [vmem:[#allocation6 + $0x3ac] sm:$0xff] %v505_v49   ;;  %v511_v51 = vld [vmem:[%s5214_s3 + $0x3b4] sm:$0xf]  ;;  %v521_v55 = vld [vmem:[%s5214_s3 + $0x3cc] sm:$0xff]  }
  0x65   :  { %510 = vst [vmem:[#allocation6 + $0x3b4] sm:$0xf] %v509_v50  ;;  %v517_v53 = vld [vmem:[%s5214_s3 + $0x3c8] sm:$0xf]  ;;  %512 = vst [vmem:[#allocation6 + $0x3b8] sm:$0xf] %v511_v51 }
  0x66   :  { %514 = vst [vmem:[#allocation6 + $0x3bc] sm:$0xff] %v513_v52   ;;  %518 = vst [vmem:[#allocation6 + $0x3c4] sm:$0xf] %v517_v53  ;;  %v519_v54 = vld [vmem:[%s5214_s3 + $0x3c4] sm:$0xf]  ;;  %v529_v58 = vld [vmem:[%s5214_s3 + $0x3dc] sm:$0xff]  }
  0x67   :  { %v525_v56 = vld [vmem:[%s5214_s3 + $0x3d8] sm:$0xf]  ;;  %520 = vst [vmem:[#allocation6 + $0x3c8] sm:$0xf] %v519_v54  ;;  %522 = vst [vmem:[#allocation6 + $0x3cc] sm:$0xff] %v521_v55   ;;  %v537_v61 = vld [vmem:[%s5214_s3 + $0x3ec] sm:$0xff]  }
  0x68   :  { %526 = vst [vmem:[#allocation6 + $0x3d4] sm:$0xf] %v525_v56  ;;  %v527_v57 = vld [vmem:[%s5214_s3 + $0x3d4] sm:$0xf]  ;;  %v533_v59 = vld [vmem:[%s5214_s3 + $0x3e8] sm:$0xf] }
  0x69   :  { %528 = vst [vmem:[#allocation6 + $0x3d8] sm:$0xf] %v527_v57  ;;  %530 = vst [vmem:[#allocation6 + $0x3dc] sm:$0xff] %v529_v58   ;;  %v535_v60 = vld [vmem:[%s5214_s3 + $0x3e4] sm:$0xf]  ;;  %v545_v0 = vld [vmem:[%s5214_s3 + $0x3fc] sm:$0xff]  }
  0x6a   :  { %534 = vst [vmem:[#allocation6 + $0x3e4] sm:$0xf] %v533_v59  ;;  %v541_v62 = vld [vmem:[%s5214_s3 + $0x3f8] sm:$0xf]  ;;  %536 = vst [vmem:[#allocation6 + $0x3e8] sm:$0xf] %v535_v60 }
  0x6b   :  { %538 = vst [vmem:[#allocation6 + $0x3ec] sm:$0xff] %v537_v61   ;;  %542 = vst [vmem:[#allocation6 + $0x3f4] sm:$0xf] %v541_v62  ;;  %v543_v63 = vld [vmem:[%s5214_s3 + $0x3f4] sm:$0xf]  ;;  %v553_v3 = vld [vmem:[%s5214_s3 + $0x40c] sm:$0xff]  }
  0x6c   :  { %v549_v1 = vld [vmem:[%s5214_s3 + $0x408] sm:$0xf]  ;;  %544 = vst [vmem:[#allocation6 + $0x3f8] sm:$0xf] %v543_v63  ;;  %546 = vst [vmem:[#allocation6 + $0x3fc] sm:$0xff] %v545_v0   ;;  %v561_v6 = vld [vmem:[%s5214_s3 + $0x41c] sm:$0xff]  }
  0x6d   :  { %550 = vst [vmem:[#allocation6 + $0x404] sm:$0xf] %v549_v1  ;;  %v551_v2 = vld [vmem:[%s5214_s3 + $0x404] sm:$0xf]  ;;  %v557_v4 = vld [vmem:[%s5214_s3 + $0x418] sm:$0xf] }
  0x6e   :  { %552 = vst [vmem:[#allocation6 + $0x408] sm:$0xf] %v551_v2  ;;  %554 = vst [vmem:[#allocation6 + $0x40c] sm:$0xff] %v553_v3   ;;  %v559_v5 = vld [vmem:[%s5214_s3 + $0x414] sm:$0xf]  ;;  %v569_v9 = vld [vmem:[%s5214_s3 + $0x42c] sm:$0xff]  }
  0x6f   :  { %558 = vst [vmem:[#allocation6 + $0x414] sm:$0xf] %v557_v4  ;;  %v565_v7 = vld [vmem:[%s5214_s3 + $0x428] sm:$0xf]  ;;  %560 = vst [vmem:[#allocation6 + $0x418] sm:$0xf] %v559_v5 }
  0x70   :  { %562 = vst [vmem:[#allocation6 + $0x41c] sm:$0xff] %v561_v6   ;;  %566 = vst [vmem:[#allocation6 + $0x424] sm:$0xf] %v565_v7  ;;  %v567_v8 = vld [vmem:[%s5214_s3 + $0x424] sm:$0xf]  ;;  %v577_v12 = vld [vmem:[%s5214_s3 + $0x43c] sm:$0xff]  }
  0x71   :  { %v573_v10 = vld [vmem:[%s5214_s3 + $0x438] sm:$0xf]  ;;  %568 = vst [vmem:[#allocation6 + $0x428] sm:$0xf] %v567_v8  ;;  %570 = vst [vmem:[#allocation6 + $0x42c] sm:$0xff] %v569_v9   ;;  %v585_v15 = vld [vmem:[%s5214_s3 + $0x44c] sm:$0xff]  }
  0x72   :  { %574 = vst [vmem:[#allocation6 + $0x434] sm:$0xf] %v573_v10  ;;  %v575_v11 = vld [vmem:[%s5214_s3 + $0x434] sm:$0xf]  ;;  %v581_v13 = vld [vmem:[%s5214_s3 + $0x448] sm:$0xf] }
  0x73   :  { %576 = vst [vmem:[#allocation6 + $0x438] sm:$0xf] %v575_v11  ;;  %578 = vst [vmem:[#allocation6 + $0x43c] sm:$0xff] %v577_v12   ;;  %v583_v14 = vld [vmem:[%s5214_s3 + $0x444] sm:$0xf]  ;;  %v593_v18 = vld [vmem:[%s5214_s3 + $0x45c] sm:$0xff]  }
  0x74   :  { %582 = vst [vmem:[#allocation6 + $0x444] sm:$0xf] %v581_v13  ;;  %v589_v16 = vld [vmem:[%s5214_s3 + $0x458] sm:$0xf]  ;;  %584 = vst [vmem:[#allocation6 + $0x448] sm:$0xf] %v583_v14 }
  0x75   :  { %586 = vst [vmem:[#allocation6 + $0x44c] sm:$0xff] %v585_v15   ;;  %590 = vst [vmem:[#allocation6 + $0x454] sm:$0xf] %v589_v16  ;;  %v591_v17 = vld [vmem:[%s5214_s3 + $0x454] sm:$0xf]  ;;  %v601_v21 = vld [vmem:[%s5214_s3 + $0x46c] sm:$0xff]  }
  0x76   :  { %v597_v19 = vld [vmem:[%s5214_s3 + $0x468] sm:$0xf]  ;;  %592 = vst [vmem:[#allocation6 + $0x458] sm:$0xf] %v591_v17  ;;  %594 = vst [vmem:[#allocation6 + $0x45c] sm:$0xff] %v593_v18  }
  0x77   :  { %598 = vst [vmem:[#allocation6 + $0x464] sm:$0xf] %v597_v19  ;;  %v599_v20 = vld [vmem:[%s5214_s3 + $0x464] sm:$0xf]  ;;  %v605_v22 = vld [vmem:[%s5214_s3 + $0x478] sm:$0xf] }
  0x78   :  { %600 = vst [vmem:[#allocation6 + $0x468] sm:$0xf] %v599_v20  ;;  %602 = vst [vmem:[#allocation6 + $0x46c] sm:$0xff] %v601_v21   ;;  %v607_v23 = vld [vmem:[%s5214_s3 + $0x474] sm:$0xf] }
  0x79   :  { %606 = vst [vmem:[#allocation6 + $0x474] sm:$0xf] %v605_v22  ;;  %v609_v24 = vld [vmem:[%s5214_s3 + $0x47c] sm:$0xf]  ;;  %608 = vst [vmem:[#allocation6 + $0x478] sm:$0xf] %v607_v23 }
  0x7a   :  { %610 = vst [vmem:[#allocation6 + $0x47c] sm:$0xf] %v609_v24 }
  0x7b   :  { %1217 = vsyncadd [#allocation8], 18432  ;;  %v4602_v25 = vld [vmem:[%s5215_s4] sm:$0xff]  ;;  %v4607_v26 = vld [vmem:[%s5215_s4 + $0x8] sm:$0xff] }
  0x7c   :  { %v4612_v27 = vld [vmem:[%s5215_s4 + $0x10] sm:$0xff]  ;;  %v4617_v28 = vld [vmem:[%s5215_s4 + $0x18] sm:$0xff]  ;;  %v4622_v29 = vld [vmem:[%s5215_s4 + $0x20] sm:$0xff] }
  0x7d   :  { %v4627_v30 = vld [vmem:[%s5215_s4 + $0x28] sm:$0xff]  ;;  %v4632_v31 = vld [vmem:[%s5215_s4 + $0x30] sm:$0xff]  ;;  %v4637_v32 = vld [vmem:[%s5215_s4 + $0x38] sm:$0xff] }
  0x7e   :  { %v4642_v33 = vld [vmem:[%s5215_s4 + $0x40] sm:$0xff]  ;;  %v4647_v34 = vld [vmem:[%s5215_s4 + $0x48] sm:$0xff]  ;;  %v4652_v35 = vld [vmem:[%s5215_s4 + $0x50] sm:$0xff] }
  0x7f   :  { %v4657_v36 = vld [vmem:[%s5215_s4 + $0x58] sm:$0xff]  ;;  %v4662_v37 = vld [vmem:[%s5215_s4 + $0x60] sm:$0xff]  ;;  %v4667_v38 = vld [vmem:[%s5215_s4 + $0x68] sm:$0xff] }
  0x80   :  { %v4672_v39 = vld [vmem:[%s5215_s4 + $0x70] sm:$0xff]  ;;  %v4677_v40 = vld [vmem:[%s5215_s4 + $0x78] sm:$0xff] }
  0x81   :  { %1290 = vsyncadd [#allocation8 + $0x1], 2048  ;;  %v3744_v41 = vld [vmem:[%s5212_s1 + $0x40] sm:$0xff]   ;;  %v3746_v43 = vld [vmem:[%s5212_s1 + $0x48] sm:$0xff]   ;;  %v3916_v61 = vmov 0   ;;  %vm1796_vm0 = vcmask 523264  }
  0x82   :  { %v3745_v42 = vld [vmem:[%s5212_s1] sm:$0xff]   ;;  %3498 = vmatprep.subr.bf16.mxu0 %v3744_v41  ;;  %v3747_v44 = vld [vmem:[%s5212_s1 + $0x8] sm:$0xff]   ;;  %v3748_v45 = vld [vmem:[%s5212_s1 + $0x50] sm:$0xff]  }
  0x83   :  { %3499 = vmatpush3.bf16.msra.mxu0 %v3745_v42  ;;  %v3749_v46 = vld [vmem:[%s5212_s1 + $0x10] sm:$0xff]   ;;  %v3750_v47 = vld [vmem:[%s5212_s1 + $0x58] sm:$0xff]   ;;  %v3752_v49 = vld [vmem:[%s5212_s1 + $0x60] sm:$0xff]  }
  0x84   :  { %3500 = vmatprep.subr.bf16.mxu0 %v3746_v43  ;;  %v3751_v48 = vld [vmem:[%s5212_s1 + $0x18] sm:$0xff]   ;;  %v3753_v50 = vld [vmem:[%s5212_s1 + $0x20] sm:$0xff]   ;;  %v3754_v51 = vld [vmem:[%s5212_s1 + $0x68] sm:$0xff]  }
  0x85   :  { %v3762_v52 = vld [vmem:[%s5211_s0 + $0x4] ss:$16 sps:$4 sm:$0xff]   ;;  %v3755_v53 = vld [vmem:[%s5212_s1 + $0x28] sm:$0xff]   ;;  %v3758_v56 = vld [vmem:[%s5212_s1 + $0x78] sm:$0xff]  }
  0x86   :  { %1865 = vmatprep.mubr.bf16.mxu0 %v3762_v52  ;;  %v3756_v54 = vld [vmem:[%s5212_s1 + $0x70] sm:$0xff]   ;;  %v3759_v57 = vld [vmem:[%s5212_s1 + $0x38] sm:$0xff]   ;;  %v3763_v59 = vld [vmem:[%s5212_s1 + $0x80] sm:$0xff]  }
  0x87   :  { %3501 = vmatpush3.bf16.msra.mxu0 %v3747_v44  ;;  %v3757_v55 = vld [vmem:[%s5212_s1 + $0x30] sm:$0xff]   ;;  %v3767_v62 = vld [vmem:[%s5212_s1 + $0x88] sm:$0xff]   ;;  %v3775_v2 = vld [vmem:[%s5212_s1 + $0x98] sm:$0xff]  }
  0x88   :  { %3502 = vmatprep.subr.bf16.mxu0 %v3748_v45  ;;  %v3760_v58 = vld [vmem:[%s5211_s0] ss:$16 sps:$4 sm:$0xff]   ;;  %v3764_v60 = vld [vmem:[%s5211_s0 + $0x24] ss:$16 sps:$4 sm:$0xff]   ;;  %v3783_v6 = vld [vmem:[%s5212_s1 + $0xa8] sm:$0xff]  }
  0x89   :  { %v3766_v63 = vld [vmem:[%s5211_s0 + $0x20] ss:$16 sps:$4 sm:$0xff]   ;;  %v3768_v0 = vld [vmem:[%s5211_s0 + $0x44] ss:$16 sps:$4 sm:$0xff]   ;;  %v3791_v10 = vld [vmem:[%s5212_s1 + $0xb8] sm:$0xff]  }
  0x8a   :  { %v3771_v1 = vld [vmem:[%s5212_s1 + $0x90] sm:$0xff]   ;;  %v3779_v5 = vld [vmem:[%s5212_s1 + $0xa0] sm:$0xff]   ;;  %v3799_v14 = vld [vmem:[%s5212_s1 + $0xc8] sm:$0xff]  }
  0x8b   :  { %3503 = vmatpush3.bf16.msra.mxu0 %v3749_v46  ;;  %v3770_v3 = vld [vmem:[%s5211_s0 + $0x40] ss:$16 sps:$4 sm:$0xff]   ;;  %v3772_v4 = vld [vmem:[%s5211_s0 + $0x64] ss:$16 sps:$4 sm:$0xff]   ;;  %v3807_v18 = vld [vmem:[%s5212_s1 + $0xd8] sm:$0xff]  }
  0x8c   :  { %3504 = vmatprep.subr.bf16.mxu0 %v3750_v47  ;;  %v3774_v7 = vld [vmem:[%s5211_s0 + $0x60] ss:$16 sps:$4 sm:$0xff]   ;;  %v3776_v8 = vld [vmem:[%s5211_s0 + $0x84] ss:$16 sps:$4 sm:$0xff]   ;;  %v3810_v46 = vld [vmem:[%s5211_s0 + $0xc] ss:$16 sps:$4 sm:$0xff]  }
  0x8d   :  { %v3787_v9 = vld [vmem:[%s5212_s1 + $0xb0] sm:$0xff]   ;;  %v3795_v13 = vld [vmem:[%s5212_s1 + $0xc0] sm:$0xff]   ;;  %v3808_v47 = vld [vmem:[%s5211_s0 + $0x8] ss:$16 sps:$4 sm:$0xff]  }
  0x8e   :  { %v3778_v11 = vld [vmem:[%s5211_s0 + $0x80] ss:$16 sps:$4 sm:$0xff]   ;;  %v3780_v12 = vld [vmem:[%s5211_s0 + $0xa4] ss:$16 sps:$4 sm:$0xff]   ;;  %v3817_v52 = vld [vmem:[%s5211_s0 + $0x6c] ss:$16 sps:$4 sm:$0xff]  }
  0x8f   :  { %3505 = vmatpush3.bf16.msra.mxu0 %v3751_v48  ;;  %v3782_v15 = vld [vmem:[%s5211_s0 + $0xa0] ss:$16 sps:$4 sm:$0xff]   ;;  %v3784_v16 = vld [vmem:[%s5211_s0 + $0xc4] ss:$16 sps:$4 sm:$0xff]   ;;  %v3811_v48 = vld [vmem:[%s5211_s0 + $0x2c] ss:$16 sps:$4 sm:$0xff]  }
  0x90   :  { %3506 = vmatprep.subr.bf16.mxu0 %v3752_v49  ;;  %v3803_v17 = vld [vmem:[%s5212_s1 + $0xd0] sm:$0xff]   ;;  %v3813_v49 = vld [vmem:[%s5211_s0 + $0x28] ss:$16 sps:$4 sm:$0xff]  }
  0x91   :  { %v3786_v19 = vld [vmem:[%s5211_s0 + $0xc0] ss:$16 sps:$4 sm:$0xff]   ;;  %v3788_v20 = vld [vmem:[%s5211_s0 + $0xe4] ss:$16 sps:$4 sm:$0xff]  }
  0x92   :  { %v3790_v21 = vld [vmem:[%s5211_s0 + $0xe0] ss:$16 sps:$4 sm:$0xff]   ;;  %v3792_v22 = vld [vmem:[%s5211_s0 + $0x104] ss:$16 sps:$4 sm:$0xff]  }
  0x93   :  { %3507 = vmatpush3.bf16.msra.mxu0 %v3753_v50  ;;  %v3794_v23 = vld [vmem:[%s5211_s0 + $0x100] ss:$16 sps:$4 sm:$0xff]   ;;  %v3796_v24 = vld [vmem:[%s5211_s0 + $0x124] ss:$16 sps:$4 sm:$0xff]   ;;  %v3814_v50 = vld [vmem:[%s5211_s0 + $0x4c] ss:$16 sps:$4 sm:$0xff]  }
  0x94   :  { %3508 = vmatprep.subr.bf16.mxu0 %v3754_v51  ;;  %v3798_v41 = vld [vmem:[%s5211_s0 + $0x120] ss:$16 sps:$4 sm:$0xff]   ;;  %v3800_v42 = vld [vmem:[%s5211_s0 + $0x144] ss:$16 sps:$4 sm:$0xff]   ;;  %v3816_v51 = vld [vmem:[%s5211_s0 + $0x48] ss:$16 sps:$4 sm:$0xff]  }
  0x95   :  { %v3802_v43 = vld [vmem:[%s5211_s0 + $0x140] ss:$16 sps:$4 sm:$0xff]   ;;  %v3804_v44 = vld [vmem:[%s5211_s0 + $0x164] ss:$16 sps:$4 sm:$0xff]  }
  0x96   :  { %v3806_v45 = vld [vmem:[%s5211_s0 + $0x160] ss:$16 sps:$4 sm:$0xff]  }
  0x97   :  { %3509 = vmatpush3.bf16.msra.mxu0 %v3755_v53  ;;  %v3819_v53 = vld [vmem:[%s5211_s0 + $0x68] ss:$16 sps:$4 sm:$0xff]  }
  0x98   :  { %3510 = vmatprep.subr.bf16.mxu0 %v3756_v54  ;;  %v3820_v54 = vld [vmem:[%s5211_s0 + $0x8c] ss:$16 sps:$4 sm:$0xff]  }
  0x9b   :  { %3511 = vmatpush3.bf16.msra.mxu0 %v3757_v55  ;;  %v3822_v55 = vld [vmem:[%s5211_s0 + $0x88] ss:$16 sps:$4 sm:$0xff]  }
  0x9c   :  { %3512 = vmatprep.subr.bf16.mxu0 %v3758_v56  ;;  %v3823_v56 = vld [vmem:[%s5211_s0 + $0xac] ss:$16 sps:$4 sm:$0xff]  }
  0x9f   :  { %3513 = vmatpush3.bf16.msra.mxu0 %v3759_v57  ;;  %v3825_v57 = vld [vmem:[%s5211_s0 + $0xa8] ss:$16 sps:$4 sm:$0xff]  }
  0xa0   :  { %1962 = vmatprep.subr.bf16.mxu0 %v3916_v61 }
  0xa2   :  { %1866 = vmatmul.mubr.bf16.vlgmr.msra.gmra.mrb[0].mxu0 %v3760_v58  ;;  %v3826_v58 = vld [vmem:[%s5211_s0 + $0xcc] ss:$16 sps:$4 sm:$0xff]  }
  0xa3   :  { %1963 = vmatpush1.bf16.msra.mxu0 %v3763_v59  ;;  %1873 = vmatprep.mubr.bf16.mxu0 %v3764_v60  ;;  %v3828_v59 = vld [vmem:[%s5211_s0 + $0xc8] ss:$16 sps:$4 sm:$0xff]   ;;  %v3829_v60 = vld [vmem:[%s5211_s0 + $0xec] ss:$16 sps:$4 sm:$0xff]  }
  0xa4   :  { %1964 = vmatprep.subr.bf16.mxu0 %v3916_v61 }
  0xa7   :  { %1965 = vmatpush1.bf16.msra.mxu0 %v3767_v62  ;;  %v3831_v62 = vld [vmem:[%s5211_s0 + $0xe8] ss:$16 sps:$4 sm:$0xff]  }
  0xa8   :  { %1966 = vmatprep.subr.bf16.mxu0 %v3916_v61 }
  0xaa   :  { %1874 = vmatmul.mubr.bf16.gmra.mrb[4].mxu0 %v3766_v63  ;;  %v3832_v63 = vld [vmem:[%s5211_s0 + $0x10c] ss:$16 sps:$4 sm:$0xff]  }
  0xab   :  { %1881 = vmatprep.mubr.bf16.mxu0 %v3768_v0  ;;  %1967 = vmatpush1.bf16.msra.mxu0 %v3771_v1  ;;  %v3834_v0 = vld [vmem:[%s5211_s0 + $0x108] ss:$16 sps:$4 sm:$0xff]   ;;  %v3835_v1 = vld [vmem:[%s5211_s0 + $0x12c] ss:$16 sps:$4 sm:$0xff]  }
  0xac   :  { %1968 = vmatprep.subr.bf16.mxu0 %v3916_v61 }
  0xaf   :  { %1969 = vmatpush1.bf16.msra.mxu0 %v3775_v2  ;;  %v3837_v2 = vld [vmem:[%s5211_s0 + $0x128] ss:$16 sps:$4 sm:$0xff]  }
  0xb0   :  { %1970 = vmatprep.subr.bf16.mxu0 %v3916_v61 }
  0xb2   :  { %1882 = vmatmul.mubr.bf16.gmra.mrb[8].mxu0 %v3770_v3  ;;  %v3838_v3 = vld [vmem:[%s5211_s0 + $0x14c] ss:$16 sps:$4 sm:$0xff]  }
  0xb3   :  { %1889 = vmatprep.mubr.bf16.mxu0 %v3772_v4  ;;  %1971 = vmatpush1.bf16.msra.mxu0 %v3779_v5  ;;  %v3840_v4 = vld [vmem:[%s5211_s0 + $0x148] ss:$16 sps:$4 sm:$0xff]   ;;  %v3841_v5 = vld [vmem:[%s5211_s0 + $0x16c] ss:$16 sps:$4 sm:$0xff]  }
  0xb4   :  { %1972 = vmatprep.subr.bf16.mxu0 %v3916_v61 }
  0xb7   :  { %1973 = vmatpush1.bf16.msra.mxu0 %v3783_v6  ;;  %v3844_v6 = vld [vmem:[%s5212_s1 + $0x120] sm:$0xff]  }
  0xb8   :  { %1974 = vmatprep.subr.bf16.mxu0 %v3916_v61 }
  0xba   :  { %1890 = vmatmul.mubr.bf16.gmra.mrb[12].mxu0 %v3774_v7  ;;  %v3845_v7 = vld [vmem:[%s5212_s1 + $0xe0] sm:$0xff]  }
  0xbb   :  { %1897 = vmatprep.mubr.bf16.mxu0 %v3776_v8  ;;  %1975 = vmatpush1.bf16.msra.mxu0 %v3787_v9  ;;  %v3843_v8 = vld [vmem:[%s5211_s0 + $0x168] ss:$16 sps:$4 sm:$0xff]  }
  0xbc   :  { %1976 = vmatprep.subr.bf16.mxu0 %v3916_v61  ;;  %v3846_v9 = vld [vmem:[%s5212_s1 + $0x128] sm:$0xff]  }
  0xbf   :  { %1977 = vmatpush1.bf16.msra.mxu0 %v3791_v10  ;;  %v3847_v10 = vld [vmem:[%s5212_s1 + $0xe8] sm:$0xff]  }
  0xc0   :  { %1978 = vmatprep.subr.bf16.mxu0 %v3916_v61 }
  0xc2   :  { %1898 = vmatmul.mubr.bf16.gmra.mrb[16].mxu0 %v3778_v11  ;;  %v3850_v11 = vld [vmem:[%s5212_s1 + $0x1a0] sm:$0xff]  }
  0xc3   :  { %1905 = vmatprep.mubr.bf16.mxu0 %v3780_v12  ;;  %1979 = vmatpush1.bf16.msra.mxu0 %v3795_v13  ;;  %v3851_v12 = vld [vmem:[%s5212_s1 + $0x160] sm:$0xff]   ;;  %v3852_v13 = vld [vmem:[%s5212_s1 + $0x1a8] sm:$0xff]  }
  0xc4   :  { %1980 = vmatprep.subr.bf16.mxu0 %v3916_v61  ;;  %3626 = vmatprep.subr.bf16.mxu1 %v3850_v11 }
  0xc5   :  { %3627 = vmatpush3.bf16.msra.mxu1 %v3851_v12 }
  0xc6   :  { %3628 = vmatprep.subr.bf16.mxu1 %v3852_v13 }
  0xc7   :  { %1981 = vmatpush1.bf16.msra.mxu0 %v3799_v14  ;;  %v3853_v14 = vld [vmem:[%s5212_s1 + $0x168] sm:$0xff]  }
  0xc8   :  { %1982 = vmatprep.subr.bf16.mxu0 %v3916_v61 }
  0xc9   :  { %3629 = vmatpush3.bf16.msra.mxu1 %v3853_v14 }
  0xca   :  { %1906 = vmatmul.mubr.bf16.gmra.mrb[20].mxu0 %v3782_v15 }
  0xcb   :  { %1913 = vmatprep.mubr.bf16.mxu0 %v3784_v16  ;;  %1983 = vmatpush1.bf16.msra.mxu0 %v3803_v17 }
  0xcc   :  { %1984 = vmatprep.subr.bf16.mxu0 %v3916_v61 }
  0xcf   :  { %1985 = vmatpush1.bf16.msra.mxu0 %v3807_v18 }
  0xd0   :  { %3586 = vmatprep.subr.bf16.mxu0 %v3844_v6  ;;  %v3872_v6 = vld [vmem:[%s5212_s1 + $0x158] sm:$0xff]  }
  0xd2   :  { %1914 = vmatmul.mubr.bf16.gmra.mrb[24].mxu0 %v3786_v19  ;;  %v3848_v19 = vld [vmem:[%s5212_s1 + $0x130] sm:$0xff]  }
  0xd3   :  { %1921 = vmatprep.mubr.bf16.mxu0 %v3788_v20  ;;  %v3856_v20 = vld [vmem:[%s5212_s1 + $0x1b0] sm:$0xff]  }
  0xd4   :  { %3630 = vmatprep.subr.bf16.mxu1 %v3856_v20 }
  0xda   :  { %1922 = vmatmul.mubr.bf16.gmra.mrb[28].mxu0 %v3790_v21 }
  0xdb   :  { %1929 = vmatprep.mubr.bf16.mxu0 %v3792_v22  ;;  %v3849_v22 = vld [vmem:[%s5212_s1 + $0xf0] sm:$0xff]  }
  0xe2   :  { %1930 = vmatmul.mubr.bf16.gmra.mrb[32].mxu0 %v3794_v23  ;;  %v3857_v23 = vld [vmem:[%s5212_s1 + $0x170] sm:$0xff]  }
  0xe3   :  { %1937 = vmatprep.mubr.bf16.mxu0 %v3796_v24  ;;  %3631 = vmatpush3.bf16.msra.mxu1 %v3857_v23 }
  0xea   :  { %1938 = vmatmul.mubr.bf16.gmra.mrb[36].mxu0 %v3798_v41  ;;  %v3854_v41 = vld [vmem:[%s5212_s1 + $0x138] sm:$0xff]  }
  0xeb   :  { %1945 = vmatprep.mubr.bf16.mxu0 %v3800_v42  ;;  %v3858_v42 = vld [vmem:[%s5212_s1 + $0x1b8] sm:$0xff]  }
  0xec   :  { %3632 = vmatprep.subr.bf16.mxu1 %v3858_v42 }
  0xf2   :  { %1946 = vmatmul.mubr.bf16.gmra.mrb[40].mxu0 %v3802_v43  ;;  %v3855_v43 = vld [vmem:[%s5212_s1 + $0xf8] sm:$0xff]  }
  0xf3   :  { %1953 = vmatprep.mubr.bf16.mxu0 %v3804_v44  ;;  %v3859_v44 = vld [vmem:[%s5212_s1 + $0x178] sm:$0xff]  }
  0xf4   :  { %3633 = vmatpush3.bf16.msra.mxu1 %v3859_v44 }
  0xfa   :  { %1954 = vmatmul.mubr.bf16.gmra.mrb[44].mxu0 %v3806_v45 }
  0xfb   :  { %3444 = vmatprep.mubr.msk.bf16.mxu0 %vm1796_vm0, %v3810_v46 }
 0x102   :  { %1995 = vmatmul.mubr.bf16.vlgmr.msra.gmra.mrb[48].mxu0 %v3808_v47 }
 0x103   :  { %3445 = vmatprep.mubr.msk.bf16.mxu0 %vm1796_vm0, %v3811_v48  ;;  %3587 = vmatpush3.bf16.msra.mxu0 %v3845_v7  ;;  %v3873_v7 = vld [vmem:[%s5212_s1 + $0x1d8] sm:$0xff]  }
 0x104   :  { %3588 = vmatprep.subr.bf16.mxu0 %v3846_v9  ;;  %v3874_v9 = vld [vmem:[%s5212_s1 + $0x118] sm:$0xff]  }
 0x107   :  { %3589 = vmatpush3.bf16.msra.mxu0 %v3847_v10  ;;  %v3875_v10 = vld [vmem:[%s5212_s1 + $0x198] sm:$0xff]  }
 0x108   :  { %3590 = vmatprep.subr.bf16.mxu0 %v3848_v19 }
 0x10a   :  { %2003 = vmatmul.mubr.bf16.gmra.mrb[52].mxu0 %v3813_v49 }
 0x10b   :  { %3446 = vmatprep.mubr.msk.bf16.mxu0 %vm1796_vm0, %v3814_v50  ;;  %3591 = vmatpush3.bf16.msra.mxu0 %v3849_v22  ;;  %v3860_v50 = vld [vmem:[%s5212_s1 + $0x140] sm:$0xff]  }
 0x10c   :  { %3592 = vmatprep.subr.bf16.mxu0 %v3854_v41 }
 0x10f   :  { %3593 = vmatpush3.bf16.msra.mxu0 %v3855_v43 }
 0x110   :  { %3594 = vmatprep.subr.bf16.mxu0 %v3860_v50 }
 0x112   :  { %2011 = vmatmul.mubr.bf16.gmra.mrb[56].mxu0 %v3816_v51  ;;  %v3861_v51 = vld [vmem:[%s5212_s1 + $0x1c0] sm:$0xff]  }
 0x113   :  { %3447 = vmatprep.mubr.msk.bf16.mxu0 %vm1796_vm0, %v3817_v52  ;;  %3634 = vmatprep.subr.bf16.mxu1 %v3861_v51 }
 0x11a   :  { %2019 = vmatmul.mubr.bf16.gmra.mrb[60].mxu0 %v3819_v53  ;;  %v3862_v53 = vld [vmem:[%s5212_s1 + $0x100] sm:$0xff]  }
 0x11b   :  { %3448 = vmatprep.mubr.msk.bf16.mxu0 %vm1796_vm0, %v3820_v54  ;;  %v3863_v54 = vld [vmem:[%s5212_s1 + $0x180] sm:$0xff]   ;;  %3595 = vmatpush3.bf16.msra.mxu0 %v3862_v53 }
 0x11c   :  { %3635 = vmatpush3.bf16.msra.mxu1 %v3863_v54 }
 0x122   :  { %2027 = vmatmul.mubr.bf16.gmra.mrb[64].mxu0 %v3822_v55  ;;  %v3864_v55 = vld [vmem:[%s5212_s1 + $0x148] sm:$0xff]  }
 0x123   :  { %3449 = vmatprep.mubr.msk.bf16.mxu0 %vm1796_vm0, %v3823_v56  ;;  %v3865_v56 = vld [vmem:[%s5212_s1 + $0x1c8] sm:$0xff]   ;;  %3596 = vmatprep.subr.bf16.mxu0 %v3864_v55 }
 0x124   :  { %3636 = vmatprep.subr.bf16.mxu1 %v3865_v56 }
 0x12a   :  { %2035 = vmatmul.mubr.bf16.gmra.mrb[68].mxu0 %v3825_v57 }
 0x12b   :  { %3450 = vmatprep.mubr.msk.bf16.mxu0 %vm1796_vm0, %v3826_v58  ;;  %v3866_v58 = vld [vmem:[%s5212_s1 + $0x108] sm:$0xff]  }
 0x12c   :  { %3597 = vmatpush3.bf16.msra.mxu0 %v3866_v58 }
 0x132   :  { %2043 = vmatmul.mubr.bf16.gmra.mrb[72].mxu0 %v3828_v59  ;;  %v3867_v59 = vld [vmem:[%s5212_s1 + $0x188] sm:$0xff]  }
 0x133   :  { %3451 = vmatprep.mubr.msk.bf16.mxu0 %vm1796_vm0, %v3829_v60  ;;  %3637 = vmatpush3.bf16.msra.mxu1 %v3867_v59 }
 0x13a   :  { %2051 = vmatmul.mubr.bf16.gmra.mrb[76].mxu0 %v3831_v62 }
 0x13b   :  { %3452 = vmatprep.mubr.msk.bf16.mxu0 %vm1796_vm0, %v3832_v63 }
 0x142   :  { %2059 = vmatmul.mubr.bf16.gmra.mrb[80].mxu0 %v3834_v0 }
 0x143   :  { %3453 = vmatprep.mubr.msk.bf16.mxu0 %vm1796_vm0, %v3835_v1  ;;  %v3868_v1 = vld [vmem:[%s5212_s1 + $0x150] sm:$0xff]  }
 0x144   :  { %3598 = vmatprep.subr.bf16.mxu0 %v3868_v1 }
 0x14a   :  { %2067 = vmatmul.mubr.bf16.gmra.mrb[84].mxu0 %v3837_v2  ;;  %v3869_v2 = vld [vmem:[%s5212_s1 + $0x1d0] sm:$0xff]  }
 0x14b   :  { %3454 = vmatprep.mubr.msk.bf16.mxu0 %vm1796_vm0, %v3838_v3  ;;  %3638 = vmatprep.subr.bf16.mxu1 %v3869_v2 }
 0x152   :  { %2075 = vmatmul.mubr.bf16.gmra.mrb[88].mxu0 %v3840_v4  ;;  %v3870_v4 = vld [vmem:[%s5212_s1 + $0x110] sm:$0xff]  }
 0x153   :  { %3455 = vmatprep.mubr.msk.bf16.mxu0 %vm1796_vm0, %v3841_v5  ;;  %v3871_v5 = vld [vmem:[%s5212_s1 + $0x190] sm:$0xff]   ;;  %3599 = vmatpush3.bf16.msra.mxu0 %v3870_v4 }
 0x154   :  { %3639 = vmatpush3.bf16.msra.mxu1 %v3871_v5  ;;  %3600 = vmatprep.subr.bf16.mxu0 %v3872_v6 }
 0x155   :  { %3640 = vmatprep.subr.bf16.mxu1 %v3873_v7 }
 0x157   :  { %3601 = vmatpush3.bf16.msra.mxu0 %v3874_v9 }
 0x158   :  { %3641 = vmatpush3.bf16.msra.mxu1 %v3875_v10 }
 0x15a   :  { %2083 = vmatmul.mubr.bf16.gmra.mrb[92].mxu0 %v3843_v8 }
 0x175   :  { %v3514_v15 = vpop.f32.mrb[0].mxu0 }
 0x176   :  { %v3515_v16 = vpop.f32.mrb[1].mxu0 }
 0x177   :  { %v4955_v17 = vadd.f32 %v3515_v16, %v3514_v15  ;;  %v3517_v18 = vpop.f32.mrb[2].mxu0 }
 0x178   :  { %v3518_v21 = vpop.f32.mrb[3].mxu0 }
 0x179   :  { %v4969_v24 = vadd.f32 %v3518_v21, %v3517_v18 }
 0x17d   :  { %v3520_v45 = vpop.f32.mrb[4].mxu0 }
 0x17e   :  { %v3521_v46 = vpop.f32.mrb[5].mxu0 }
 0x17f   :  { %v4983_v47 = vadd.f32 %v3521_v46, %v3520_v45  ;;  %v3523_v48 = vpop.f32.mrb[6].mxu0 }
 0x180   :  { %v3524_v49 = vpop.f32.mrb[7].mxu0 }
 0x181   :  { %v4991_v52 = vadd.f32 %v3524_v49, %v3523_v48 }
 0x185   :  { %v3526_v57 = vpop.f32.mrb[8].mxu0 }
 0x186   :  { %v3527_v60 = vpop.f32.mrb[9].mxu0 }
 0x187   :  { %v5011_v62 = vadd.f32 %v3527_v60, %v3526_v57  ;;  %v3529_v63 = vpop.f32.mrb[10].mxu0  ;;  %v5062_v60 = vld [vmem:[%s5212_s1 + $0x1e0] sm:$0xff]  }
 0x188   :  { %v3530_v0 = vpop.f32.mrb[11].mxu0  ;;  %3700 = vmatprep.subr.bf16.mxu0 %v5062_v60 }
 0x189   :  { %v5019_v3 = vadd.f32 %v3530_v0, %v3529_v63 }
 0x18d   :  { %v3532_v8 = vpop.f32.mrb[12].mxu0 }
 0x18e   :  { %v3533_v11 = vpop.f32.mrb[13].mxu0 }
 0x18f   :  { %v5039_v12 = vadd.f32 %v3533_v11, %v3532_v8  ;;  %v3535_v13 = vpop.f32.mrb[14].mxu0 }
 0x190   :  { %v3536_v14 = vpop.f32.mrb[15].mxu0 }
 0x191   :  { %v5041_v15 = vadd.f32 %v3536_v14, %v3535_v13  ;;  %v1396_v13 = vlaneseq }
 0x195   :  { %v3538_v16 = vpop.f32.mrb[16].mxu0 }
 0x196   :  { %v3539_v18 = vpop.f32.mrb[17].mxu0 }
 0x197   :  { %v5043_v19 = vadd.f32 %v3539_v18, %v3538_v16  ;;  %v3541_v20 = vpop.f32.mrb[18].mxu0 }
 0x198   :  { %v3542_v21 = vpop.f32.mrb[19].mxu0 }
 0x199   :  { %v5045_v22 = vadd.f32 %v3542_v21, %v3541_v20 }
 0x19d   :  { %v3544_v23 = vpop.f32.mrb[20].mxu0 }
 0x19e   :  { %v3545_v41 = vpop.f32.mrb[21].mxu0 }
 0x19f   :  { %v5047_v42 = vadd.f32 %v3545_v41, %v3544_v23  ;;  %v3547_v43 = vpop.f32.mrb[22].mxu0  ;;  %v5075_v23 = vshrl.u32 %v1396_v13, 7 }
 0x1a0   :  { %v3548_v44 = vpop.f32.mrb[23].mxu0 }
 0x1a1   :  { %v5049_v45 = vadd.f32 %v3548_v44, %v3547_v43  ;;  %v1398_v43 = vsub.s32 0, %v5075_v23 }
 0x1a5   :  { %v3550_v46 = vpop.f32.mrb[24].mxu0 }
 0x1a6   :  { %v3551_v48 = vpop.f32.mrb[25].mxu0 }
 0x1a7   :  { %v5051_v49 = vadd.f32 %v3551_v48, %v3550_v46  ;;  %v3553_v50 = vpop.f32.mrb[26].mxu0  ;;  %v5083_v46 = vld [vmem:[%s5213_s2] sm:$0xff] }
 0x1a8   :  { %v3554_v51 = vpop.f32.mrb[27].mxu0 }
 0x1a9   :  { %v5053_v53 = vadd.f32 %v3554_v51, %v3553_v50 }
 0x1ad   :  { %v3556_v54 = vpop.f32.mrb[28].mxu0 }
 0x1ae   :  { %v3557_v55 = vpop.f32.mrb[29].mxu0 }
 0x1af   :  { %v5055_v56 = vadd.f32 %v3557_v55, %v3556_v54  ;;  %v3559_v57 = vpop.f32.mrb[30].mxu0  ;;  %v5088_v55 = vrot.slane %v5083_v46, %v1398_v43 }
 0x1b0   :  { %v3560_v58 = vpop.f32.mrb[31].mxu0 }
 0x1b1   :  { %v5057_v59 = vadd.f32 %v3560_v58, %v3559_v57  ;;  %v1868_v58 = vadd.f32 %v4955_v17, %v5088_v55  ;;  %v1879_v17 = vadd.f32 %v4991_v52, %v5088_v55 }
 0x1b5   :  { %v3562_v63 = vpop.f32.mrb[32].mxu0 }
 0x1b6   :  { %v3563_v0 = vpop.f32.mrb[33].mxu0 }
 0x1b7   :  { %v5065_v1 = vadd.f32 %v3563_v0, %v3562_v63  ;;  %v3565_v2 = vpop.f32.mrb[34].mxu0 }
 0x1b8   :  { %v3566_v4 = vpop.f32.mrb[35].mxu0 }
 0x1b9   :  { %v5067_v5 = vadd.f32 %v3566_v4, %v3565_v2  ;;  %v1871_v4 = vadd.f32 %v4969_v24, %v5088_v55 }
 0x1bd   :  { %v3568_v6 = vpop.f32.mrb[36].mxu0 }
 0x1be   :  { %v3569_v7 = vpop.f32.mrb[37].mxu0 }
 0x1bf   :  { %v5069_v8 = vadd.f32 %v3569_v7, %v3568_v6  ;;  %v3571_v9 = vpop.f32.mrb[38].mxu0 }
 0x1c0   :  { %v3572_v10 = vpop.f32.mrb[39].mxu0 }
 0x1c1   :  { %v5071_v11 = vadd.f32 %v3572_v10, %v3571_v9 }
 0x1c5   :  { %v3574_v14 = vpop.f32.mrb[40].mxu0 }
 0x1c6   :  { %v3575_v16 = vpop.f32.mrb[41].mxu0 }
 0x1c7   :  { %v5073_v18 = vadd.f32 %v3575_v16, %v3574_v14  ;;  %v3577_v20 = vpop.f32.mrb[42].mxu0  ;;  %v1876_v14 = vadd.f32 %v4983_v47, %v5088_v55  ;;  %v1887_v47 = vadd.f32 %v5019_v3, %v5088_v55 }
 0x1c8   :  { %v3578_v21 = vpop.f32.mrb[43].mxu0 }
 0x1c9   :  { %v5077_v41 = vadd.f32 %v3578_v21, %v3577_v20 }
 0x1cd   :  { %v3580_v44 = vpop.f32.mrb[44].mxu0 }
 0x1ce   :  { %v3581_v48 = vpop.f32.mrb[45].mxu0 }
 0x1cf   :  { %v5085_v50 = vadd.f32 %v3581_v48, %v3580_v44  ;;  %v3583_v51 = vpop.f32.mrb[46].mxu0 }
 0x1d0   :  { %v3584_v54 = vpop.f32.mrb[47].mxu0 }
 0x1d1   :  { %v5090_v57 = vadd.f32 %v3584_v54, %v3583_v51  ;;  %v1884_v54 = vadd.f32 %v5011_v62, %v5088_v55  ;;  %v1892_v62 = vadd.f32 %v5039_v12, %v5088_v55  ;;  %v1900_v12 = vadd.f32 %v5043_v19, %v5088_v55 }
 0x1d2   :  { %v1908_v19 = vadd.f32 %v5047_v42, %v5088_v55  ;;  %v1916_v42 = vadd.f32 %v5051_v49, %v5088_v55  ;;  %v1924_v49 = vadd.f32 %v5055_v56, %v5088_v55 }
 0x1d5   :  { %v1996_v63 = vpop.f32.mrb[48].mxu0 }
 0x1d6   :  { %v1997_v0 = vadd.f32 %v1996_v63, %v1868_v58  ;;  %v1998_v2 = vpop.f32.mrb[49].mxu0 }
 0x1d7   :  { %v1999_v6 = vpop.f32.mrb[50].mxu0 }
 0x1d8   :  { %v2091_v7 = vmax.f32 %v1997_v0, 0.0  ;;  %v2000_v9 = vadd.f32 %v1999_v6, %v1871_v4  ;;  %v2001_v10 = vpop.f32.mrb[51].mxu0 }
 0x1da   :  { %2115 = vst [vmem:[#allocation2] sm:$0xff] %v2091_v7  ;;  %v2092_v13 = vmax.f32 %v2000_v9, 0.0 }
 0x1dc   :  { %2116 = vst [vmem:[#allocation2 + $0x8] sm:$0xff] %v2092_v13 }
 0x1dd   :  { %v2004_v16 = vpop.f32.mrb[52].mxu0 }
 0x1de   :  { %v2005_v20 = vadd.f32 %v2004_v16, %v1876_v14  ;;  %v2006_v21 = vpop.f32.mrb[53].mxu0 }
 0x1df   :  { %v2007_v43 = vpop.f32.mrb[54].mxu0 }
 0x1e0   :  { %v2093_v44 = vmax.f32 %v2005_v20, 0.0  ;;  %v2008_v48 = vadd.f32 %v2007_v43, %v1879_v17  ;;  %v2009_v24 = vpop.f32.mrb[55].mxu0  ;;  %v1895_v17 = vadd.f32 %v5041_v15, %v5088_v55  ;;  %v1903_v15 = vadd.f32 %v5045_v22, %v5088_v55 }
 0x1e2   :  { %2117 = vst [vmem:[#allocation2 + $0x10] sm:$0xff] %v2093_v44  ;;  %v2094_v51 = vmax.f32 %v2008_v48, 0.0 }
 0x1e4   :  { %2118 = vst [vmem:[#allocation2 + $0x18] sm:$0xff] %v2094_v51 }
 0x1e5   :  { %v2012_v58 = vpop.f32.mrb[56].mxu0 }
 0x1e6   :  { %v2013_v63 = vadd.f32 %v2012_v58, %v1884_v54  ;;  %v2014_v0 = vpop.f32.mrb[57].mxu0 }
 0x1e7   :  { %v2015_v2 = vpop.f32.mrb[58].mxu0 }
 0x1e8   :  { %v2095_v4 = vmax.f32 %v2013_v63, 0.0  ;;  %v2016_v6 = vadd.f32 %v2015_v2, %v1887_v47  ;;  %v2017_v52 = vpop.f32.mrb[59].mxu0 }
 0x1e9   :  { %v2139_v7 = vld [vmem:[#allocation2] ss:$3 sm:$0xff]  ;;  %v2147_v9 = vld [vmem:[#allocation2 + $0x1] ss:$3 sm:$0xff]  ;;  %v2159_v14 = vld [vmem:[#allocation2 + $0x2] ss:$3 sm:$0xff] }
 0x1ea   :  { %v2154_v10 = vmax.f32 %v2139_v7, %v2147_v9  ;;  %2119 = vst [vmem:[#allocation2 + $0x20] sm:$0xff] %v2095_v4  ;;  %v2096_v13 = vmax.f32 %v2016_v6, 0.0 }
 0x1ec   :  { %v5104_v16 = vmax.f32 %v2154_v10, %v2159_v14  ;;  %2120 = vst [vmem:[#allocation2 + $0x28] sm:$0xff] %v2096_v13 }
 0x1ed   :  { %v2020_v20 = vpop.f32.mrb[60].mxu0 }
 0x1ee   :  { %2170 = vst [vmem:[#allocation3] sm:$0xff] %v5104_v16  ;;  %v2021_v3 = vadd.f32 %v2020_v20, %v1892_v62  ;;  %v2022_v21 = vpop.f32.mrb[61].mxu0 }
 0x1ef   :  { %v2023_v43 = vpop.f32.mrb[62].mxu0 }
 0x1f0   :  { %v2097_v44 = vmax.f32 %v2021_v3, 0.0  ;;  %v2024_v48 = vadd.f32 %v2023_v43, %v1895_v17  ;;  %v2025_v24 = vpop.f32.mrb[63].mxu0  ;;  %v1911_v3 = vadd.f32 %v5049_v45, %v5088_v55 }
 0x1f2   :  { %2121 = vst [vmem:[#allocation2 + $0x30] sm:$0xff] %v2097_v44  ;;  %v2098_v51 = vmax.f32 %v2024_v48, 0.0 }
 0x1f3   :  { %v2141_v54 = vld [vmem:[#allocation2 + $0x18] ss:$3 sm:$0xff]  ;;  %v2149_v58 = vld [vmem:[#allocation2 + $0x19] ss:$3 sm:$0xff]  ;;  %v2161_v0 = vld [vmem:[#allocation2 + $0x1a] ss:$3 sm:$0xff] }
 0x1f4   :  { %v2155_v63 = vmax.f32 %v2141_v54, %v2149_v58  ;;  %2122 = vst [vmem:[#allocation2 + $0x38] sm:$0xff] %v2098_v51 }
 0x1f5   :  { %v2028_v47 = vpop.f32.mrb[64].mxu0 }
 0x1f6   :  { %v5113_v2 = vmax.f32 %v2155_v63, %v2161_v0  ;;  %v2029_v4 = vadd.f32 %v2028_v47, %v1900_v12  ;;  %v2030_v6 = vpop.f32.mrb[65].mxu0  ;;  %v1919_v0 = vadd.f32 %v5053_v53, %v5088_v55  ;;  %v1927_v53 = vadd.f32 %v5057_v59, %v5088_v55 }
 0x1f7   :  { %v2031_v52 = vpop.f32.mrb[66].mxu0 }
 0x1f8   :  { %2171 = vst [vmem:[#allocation3 + $0x8] sm:$0xff] %v5113_v2  ;;  %v2099_v7 = vmax.f32 %v2029_v4, 0.0  ;;  %v2032_v9 = vadd.f32 %v2031_v52, %v1903_v15  ;;  %v2033_v10 = vpop.f32.mrb[67].mxu0 }
 0x1fa   :  { %2123 = vst [vmem:[#allocation2 + $0x40] sm:$0xff] %v2099_v7  ;;  %v2100_v13 = vmax.f32 %v2032_v9, 0.0 }
 0x1fc   :  { %2124 = vst [vmem:[#allocation2 + $0x48] sm:$0xff] %v2100_v13 }
 0x1fd   :  { %v2036_v14 = vpop.f32.mrb[68].mxu0 }
 0x1fe   :  { %v2037_v62 = vadd.f32 %v2036_v14, %v1908_v19  ;;  %v2038_v20 = vpop.f32.mrb[69].mxu0 }
 0x1ff   :  { %v2039_v21 = vpop.f32.mrb[70].mxu0  ;;  %v2218_v19 = vld [vmem:[#allocation3 + $0x1] sm:$0xff] }
 0x200   :  { %v2101_v22 = vmax.f32 %v2037_v62, 0.0  ;;  %v2040_v17 = vadd.f32 %v2039_v21, %v1911_v3  ;;  %v2041_v43 = vpop.f32.mrb[71].mxu0  ;;  %v2234_v14 = vld [vmem:[#allocation3 + $0x3] sm:$0xff] }
 0x201   :  { %v2143_v44 = vld [vmem:[#allocation2 + $0x30] ss:$3 sm:$0xff]  ;;  %v2151_v48 = vld [vmem:[#allocation2 + $0x31] ss:$3 sm:$0xff]  ;;  %v2163_v54 = vld [vmem:[#allocation2 + $0x32] ss:$3 sm:$0xff] }
 0x202   :  { %v2156_v24 = vmax.f32 %v2143_v44, %v2151_v48  ;;  %2125 = vst [vmem:[#allocation2 + $0x50] sm:$0xff] %v2101_v22  ;;  %v2102_v51 = vmax.f32 %v2040_v17, 0.0 }
 0x204   :  { %v5122_v58 = vmax.f32 %v2156_v24, %v2163_v54  ;;  %2126 = vst [vmem:[#allocation2 + $0x58] sm:$0xff] %v2102_v51  ;;  %v2226_v24 = vld [vmem:[#allocation3 + $0x2] sm:$0xff]  ;;  %v2250_v54 = vpack.c.bf16 %v5113_v2, %v5104_v16  ;;  %v3878_v16 = vld [vmem:[%s5212_s1 + $0x1f0] sm:$0xff]   ;;  %v1932_v2 = vadd.f32 %v5065_v1, %v5088_v55 }
 0x205   :  { %v2044_v63 = vpop.f32.mrb[72].mxu0 }
 0x206   :  { %2172 = vst [vmem:[#allocation3 + $0x10] sm:$0xff] %v5122_v58  ;;  %v2045_v45 = vadd.f32 %v2044_v63, %v1916_v42  ;;  %v2046_v12 = vpop.f32.mrb[73].mxu0  ;;  %v3877_v42 = vld [vmem:[%s5212_s1 + $0x1e8] sm:$0xff]  }
 0x207   :  { %v2047_v47 = vpop.f32.mrb[74].mxu0 }
 0x208   :  { %v2103_v4 = vmax.f32 %v2045_v45, 0.0  ;;  %v2048_v6 = vadd.f32 %v2047_v47, %v1919_v0  ;;  %v2049_v15 = vpop.f32.mrb[75].mxu0 }
 0x20a   :  { %2127 = vst [vmem:[#allocation2 + $0x60] sm:$0xff] %v2103_v4  ;;  %v2104_v52 = vmax.f32 %v2048_v6, 0.0  ;;  %v1935_v6 = vadd.f32 %v5067_v5, %v5088_v55  ;;  %v3880_v5 = vld [vmem:[%s5212_s1 + $0x200] sm:$0xff]  }
 0x20b   :  { %v2145_v7 = vld [vmem:[#allocation2 + $0x48] ss:$3 sm:$0x7f]  ;;  %v2153_v9 = vld [vmem:[#allocation2 + $0x49] ss:$3 sm:$0x7f] }
 0x20c   :  { %v2157_v10 = vmax.f32 %v2145_v7, %v2153_v9  ;;  %v2165_v13 = vld [vmem:[#allocation2 + $0x4a] ss:$3 sm:$0x7f]  ;;  %2128 = vst [vmem:[#allocation2 + $0x68] sm:$0xff] %v2104_v52 }
 0x20d   :  { %v2052_v62 = vpop.f32.mrb[76].mxu0  ;;  %v2219_v20 = vld [vmem:[#allocation3 + $0x9] sm:$0xff] }
 0x20e   :  { %v2235_v3 = vld [vmem:[#allocation3 + $0xb] sm:$0xff]  ;;  %v2169_v22 = vmax.f32 %v2157_v10, %v2165_v13  ;;  %v2053_v17 = vadd.f32 %v2052_v62, %v1924_v49  ;;  %v2054_v43 = vpop.f32.mrb[77].mxu0  ;;  %v2251_v44 = vpack.c.bf16 %v2219_v20, %v2218_v19  ;;  %v1940_v19 = vadd.f32 %v5069_v8, %v5088_v55 }
 0x20f   :  { %v2227_v21 = vld [vmem:[#allocation3 + $0xa] sm:$0xff]  ;;  %v2253_v48 = vpack.c.bf16 %v2235_v3, %v2234_v14  ;;  %v2055_v51 = vpop.f32.mrb[78].mxu0 }
 0x210   :  { %v2252_v56 = vpack.c.bf16 %v2227_v21, %v2226_v24  ;;  %2173 = vst [vmem:[#allocation3 + $0x18] sm:$0x7f] %v2169_v22  ;;  %v2105_v59 = vmax.f32 %v2053_v17, 0.0  ;;  %v2056_v63 = vadd.f32 %v2055_v51, %v1927_v53  ;;  %v2057_v45 = vpop.f32.mrb[79].mxu0  ;;  %2626 = vmatprep.mubr.bf16.mxu0 %v2251_v44  ;;  %v1943_v21 = vadd.f32 %v5071_v11, %v5088_v55  ;;  %v3881_v17 = vld [vmem:[%s5212_s1 + $0x208] sm:$0xff]   ;;  %v3882_v24 = vld [vmem:[%s5212_s1 + $0x210] sm:$0xff]  }
 0x211   :  { %2691 = vmatprep.mubr.bf16.mxu1 %v2253_v48  ;;  %2627 = vmatmul.mubr.bf16.vlgmr.msra.gmra.mrb[96].mxu0 %v2250_v54  ;;  %v1948_v11 = vadd.f32 %v5073_v18, %v5088_v55 }
 0x212   :  { %2692 = vmatmul.mubr.bf16.vlgmr.msra.gmra.mrb[0].mxu1 %v2252_v56  ;;  %2129 = vst [vmem:[#allocation2 + $0x70] sm:$0xff] %v2105_v59  ;;  %v2106_v12 = vmax.f32 %v2056_v63, 0.0  ;;  %3701 = vmatpush3.bf16.msra.mxu0 %v5062_v60  ;;  %v3879_v60 = vld [vmem:[%s5212_s1 + $0x1f8] sm:$0xff]  }
 0x213   :  { %3702 = vmatprep.subr.bf16.mxu0 %v3877_v42 }
 0x214   :  { %2130 = vst [vmem:[#allocation2 + $0x78] sm:$0xff] %v2106_v12 }
 0x215   :  { %v2060_v0 = vpop.f32.mrb[80].mxu0 }
 0x216   :  { %v2061_v47 = vadd.f32 %v2060_v0, %v1932_v2  ;;  %v2062_v4 = vpop.f32.mrb[81].mxu0  ;;  %3703 = vmatpush3.bf16.msra.mxu0 %v3877_v42  ;;  %v1951_v42 = vadd.f32 %v5077_v41, %v5088_v55 }
 0x217   :  { %v2063_v15 = vpop.f32.mrb[82].mxu0  ;;  %3704 = vmatprep.subr.bf16.mxu0 %v3878_v16  ;;  %v2220_v59 = vld [vmem:[#allocation3 + $0x11] sm:$0xff] }
 0x218   :  { %v2107_v52 = vmax.f32 %v2061_v47, 0.0  ;;  %v2064_v7 = vadd.f32 %v2063_v15, %v1935_v6  ;;  %v2065_v9 = vpop.f32.mrb[83].mxu0  ;;  %v2236_v63 = vld [vmem:[#allocation3 + $0x13] sm:$0xff] }
 0x219   :  { %v2228_v18 = vld [vmem:[#allocation3 + $0x12] sm:$0xff] }
 0x21a   :  { %2131 = vst [vmem:[#allocation2 + $0x80] sm:$0xff] %v2107_v52  ;;  %v2108_v10 = vmax.f32 %v2064_v7, 0.0  ;;  %3705 = vmatpush3.bf16.msra.mxu0 %v3878_v16 }
 0x21b   :  { %v2175_v1 = vld [vmem:[#allocation2 + $0x63] ss:$3 sm:$0xff]  ;;  %v2183_v13 = vld [vmem:[#allocation2 + $0x64] ss:$3 sm:$0xff]  ;;  %3706 = vmatprep.subr.bf16.mxu0 %v3879_v60  ;;  %v2195_v14 = vld [vmem:[#allocation2 + $0x65] ss:$3 sm:$0xff] }
 0x21c   :  { %v2190_v49 = vmax.f32 %v2175_v1, %v2183_v13  ;;  %2132 = vst [vmem:[#allocation2 + $0x88] sm:$0xff] %v2108_v10  ;;  %v3883_v10 = vld [vmem:[%s5212_s1 + $0x218] sm:$0xff]  }
 0x21d   :  { %v2068_v62 = vpop.f32.mrb[84].mxu0 }
 0x21e   :  { %v2202_v53 = vmax.f32 %v2190_v49, %v2195_v14  ;;  %v2069_v20 = vadd.f32 %v2068_v62, %v1940_v19  ;;  %v2070_v3 = vpop.f32.mrb[85].mxu0  ;;  %3707 = vmatpush3.bf16.msra.mxu0 %v3879_v60  ;;  %v1956_v19 = vadd.f32 %v5085_v50, %v5088_v55 }
 0x21f   :  { %v2071_v22 = vpop.f32.mrb[86].mxu0  ;;  %3708 = vmatprep.subr.bf16.mxu0 %v3880_v5 }
 0x220   :  { %2206 = vst [vmem:[#allocation3 + $0x1f] sm:$0xff] %v2202_v53  ;;  %v2109_v43 = vmax.f32 %v2069_v20, 0.0  ;;  %v2072_v44 = vadd.f32 %v2071_v22, %v1943_v21  ;;  %v2073_v48 = vpop.f32.mrb[87].mxu0  ;;  %v1959_v53 = vadd.f32 %v5090_v57, %v5088_v55 }
 0x222   :  { %2133 = vst [vmem:[#allocation2 + $0x90] sm:$0xff] %v2109_v43  ;;  %v2110_v8 = vmax.f32 %v2072_v44, 0.0  ;;  %3709 = vmatpush3.bf16.msra.mxu0 %v3880_v5 }
 0x223   :  { %3710 = vmatprep.subr.bf16.mxu0 %v3881_v17 }
 0x224   :  { %2134 = vst [vmem:[#allocation2 + $0x98] sm:$0xff] %v2110_v8 }
 0x225   :  { %v2076_v51 = vpop.f32.mrb[88].mxu0 }
 0x226   :  { %v2077_v54 = vadd.f32 %v2076_v51, %v1948_v11  ;;  %v2078_v56 = vpop.f32.mrb[89].mxu0  ;;  %3711 = vmatpush3.bf16.msra.mxu0 %v3881_v17 }
 0x227   :  { %v2079_v45 = vpop.f32.mrb[90].mxu0  ;;  %v2221_v12 = vld [vmem:[#allocation3 + $0x19] sm:$0xff]  ;;  %3712 = vmatprep.subr.bf16.mxu0 %v3882_v24 }
 0x228   :  { %v2237_v16 = vld [vmem:[#allocation3 + $0x1b] sm:$0xff]  ;;  %v2111_v0 = vmax.f32 %v2077_v54, 0.0  ;;  %v2080_v47 = vadd.f32 %v2079_v45, %v1951_v42  ;;  %v2081_v4 = vpop.f32.mrb[91].mxu0  ;;  %v2256_v6 = vpack.c.bf16 %v2221_v12, %v2220_v59 }
 0x229   :  { %v2213_v2 = vld [vmem:[#allocation3 + $0x18] sm:$0xff]  ;;  %v2258_v15 = vpack.c.bf16 %v2237_v16, %v2236_v63 }
 0x22a   :  { %v2229_v60 = vld [vmem:[#allocation3 + $0x1a] sm:$0xff]  ;;  %v2255_v9 = vpack.c.bf16 %v2213_v2, %v5122_v58  ;;  %2135 = vst [vmem:[#allocation2 + $0xa0] sm:$0xff] %v2111_v0  ;;  %v2112_v13 = vmax.f32 %v2080_v47, 0.0  ;;  %2634 = vmatprep.mubr.bf16.mxu0 %v2256_v6  ;;  %3713 = vmatpush3.bf16.msra.mxu0 %v3882_v24  ;;  %v2243_v6 = vld [vmem:[#allocation3 + $0xc] sm:$0xff] }
 0x22b   :  { %v2177_v52 = vld [vmem:[#allocation2 + $0x7b] ss:$3 sm:$0xff]  ;;  %v2185_v7 = vld [vmem:[#allocation2 + $0x7c] ss:$3 sm:$0xff]  ;;  %v2257_v41 = vpack.c.bf16 %v2229_v60, %v2228_v18  ;;  %2699 = vmatprep.mubr.bf16.mxu1 %v2258_v15  ;;  %v2197_v5 = vld [vmem:[#allocation2 + $0x7d] ss:$3 sm:$0xff]  ;;  %3714 = vmatprep.subr.bf16.mxu0 %v3883_v10 }
 0x22c   :  { %v2191_v1 = vmax.f32 %v2177_v52, %v2185_v7  ;;  %2635 = vmatmul.mubr.bf16.gmra.mrb[100].mxu0 %v2255_v9  ;;  %2136 = vst [vmem:[#allocation2 + $0xa8] sm:$0xff] %v2112_v13 }
 0x22d   :  { %2700 = vmatmul.mubr.bf16.gmra.mrb[4].mxu1 %v2257_v41  ;;  %v2084_v58 = vpop.f32.mrb[92].mxu0 }
 0x22e   :  { %v2203_v49 = vmax.f32 %v2191_v1, %v2197_v5  ;;  %v2085_v14 = vadd.f32 %v2084_v58, %v1956_v19  ;;  %v2086_v62 = vpop.f32.mrb[93].mxu0  ;;  %3715 = vmatpush3.bf16.msra.mxu0 %v3883_v10 }
 0x22f   :  { %v2087_v20 = vpop.f32.mrb[94].mxu0 }
 0x230   :  { %2207 = vst [vmem:[#allocation3 + $0x27] sm:$0xff] %v2203_v49  ;;  %v2113_v3 = vmax.f32 %v2085_v14, 0.0  ;;  %v2088_v21 = vadd.f32 %v2087_v20, %v1959_v53  ;;  %v2089_v22 = vpop.f32.mrb[95].mxu0  ;;  %v2242_v49 = vld [vmem:[#allocation3 + $0x4] sm:$0xff]  ;;  %v2245_v14 = vld [vmem:[#allocation3 + $0x1c] sm:$0xff]  ;;  %v2244_v53 = vld [vmem:[#allocation3 + $0x14] sm:$0xff] }
 0x231   :  { %v2254_v58 = vpack.c.bf16 %v2243_v6, %v2242_v49  ;;  %v2259_v20 = vpack.c.bf16 %v2245_v14, %v2244_v53 }
 0x232   :  { %2137 = vst [vmem:[#allocation2 + $0xb0] sm:$0xff] %v2113_v3  ;;  %v2114_v17 = vmax.f32 %v2088_v21, 0.0 }
 0x233   :  { %v2179_v43 = vld [vmem:[#allocation2 + $0x93] ss:$3 sm:$0xff]  ;;  %v2187_v44 = vld [vmem:[#allocation2 + $0x94] ss:$3 sm:$0xff]  ;;  %v2199_v50 = vld [vmem:[#allocation2 + $0x95] ss:$3 sm:$0xff] }
 0x234   :  { %v2192_v48 = vmax.f32 %v2179_v43, %v2187_v44  ;;  %2138 = vst [vmem:[#allocation2 + $0xb8] sm:$0xff] %v2114_v17  ;;  %v2352_v44 = vsub.s32 1, %v5075_v23 }
 0x236   :  { %v2204_v8 = vmax.f32 %v2192_v48, %v2199_v50 }
 0x237   :  { %v2222_v55 = vld [vmem:[#allocation3 + $0x21] sm:$0xff] }
 0x238   :  { %2208 = vst [vmem:[#allocation3 + $0x2f] sm:$0xff] %v2204_v8  ;;  %v2238_v57 = vld [vmem:[#allocation3 + $0x23] sm:$0xff]  ;;  %v2353_v8 = vrot.slane %v5083_v46, %v2352_v44 }
 0x239   :  { %v2214_v42 = vld [vmem:[#allocation3 + $0x20] sm:$0xff] }
 0x23a   :  { %v2230_v0 = vld [vmem:[#allocation3 + $0x22] sm:$0xff] }
 0x23b   :  { %v2181_v24 = vld [vmem:[#allocation2 + $0xab] ss:$3 sm:$0x7f]  ;;  %v2189_v11 = vld [vmem:[#allocation2 + $0xac] ss:$3 sm:$0x7f] }
 0x23c   :  { %v2193_v51 = vmax.f32 %v2181_v24, %v2189_v11  ;;  %v2201_v54 = vld [vmem:[#allocation2 + $0xad] ss:$3 sm:$0x7f]  ;;  %v2246_v3 = vld [vmem:[#allocation3 + $0x24] sm:$0xff] }
 0x23e   :  { %v2205_v56 = vmax.f32 %v2193_v51, %v2201_v54 }
 0x23f   :  { %v2223_v59 = vld [vmem:[#allocation3 + $0x29] sm:$0xff] }
 0x240   :  { %v2239_v63 = vld [vmem:[#allocation3 + $0x2b] sm:$0xff]  ;;  %2209 = vst [vmem:[#allocation3 + $0x37] sm:$0x7f] %v2205_v56  ;;  %v2261_v12 = vpack.c.bf16 %v2223_v59, %v2222_v55 }
 0x241   :  { %v2215_v45 = vld [vmem:[#allocation3 + $0x28] sm:$0xff]  ;;  %v2263_v16 = vpack.c.bf16 %v2239_v63, %v2238_v57 }
 0x242   :  { %v2260_v2 = vpack.c.bf16 %v2215_v45, %v2214_v42  ;;  %v2231_v47 = vld [vmem:[#allocation3 + $0x2a] sm:$0xff]  ;;  %2642 = vmatprep.mubr.bf16.mxu0 %v2261_v12 }
 0x243   :  { %v2262_v4 = vpack.c.bf16 %v2231_v47, %v2230_v0  ;;  %2707 = vmatprep.mubr.bf16.mxu1 %v2263_v16  ;;  %v2247_v62 = vld [vmem:[#allocation3 + $0x2c] sm:$0xff] }
 0x244   :  { %2643 = vmatmul.mubr.bf16.gmra.mrb[104].mxu0 %v2260_v2  ;;  %v2264_v21 = vpack.c.bf16 %v2247_v62, %v2246_v3 }
 0x245   :  { %2708 = vmatmul.mubr.bf16.gmra.mrb[8].mxu1 %v2262_v4 }
 0x247   :  { %v2224_v15 = vld [vmem:[#allocation3 + $0x31] sm:$0xff]  ;;  %v2225_v18 = vld [vmem:[#allocation3 + $0x39] sm:$0x3]  ;;  %v2241_v7 = vld [vmem:[#allocation3 + $0x3b] sm:$0x3] }
 0x248   :  { %v2240_v60 = vld [vmem:[#allocation3 + $0x33] sm:$0xff]  ;;  %v2266_v52 = vpack.c.bf16 %v2225_v18, %v2224_v15  ;;  %v2249_v17 = vld [vmem:[#allocation3 + $0x3c] sm:$0x3] }
 0x249   :  { %v2216_v9 = vld [vmem:[#allocation3 + $0x30] sm:$0xff]  ;;  %v2217_v41 = vld [vmem:[#allocation3 + $0x38] sm:$0x3]  ;;  %v2268_v10 = vpack.c.bf16 %v2241_v7, %v2240_v60  ;;  %v2233_v5 = vld [vmem:[#allocation3 + $0x3a] sm:$0x3] }
 0x24a   :  { %v2265_v1 = vpack.c.bf16 %v2217_v41, %v2216_v9  ;;  %v2232_v13 = vld [vmem:[#allocation3 + $0x32] sm:$0xff]  ;;  %2650 = vmatprep.mubr.bf16.mxu0 %v2266_v52 }
 0x24b   :  { %v2267_v19 = vpack.c.bf16 %v2233_v5, %v2232_v13  ;;  %2715 = vmatprep.mubr.bf16.mxu1 %v2268_v10  ;;  %v2248_v22 = vld [vmem:[#allocation3 + $0x34] sm:$0xff] }
 0x24c   :  { %2651 = vmatmul.mubr.bf16.gmra.mrb[108].mxu0 %v2265_v1  ;;  %v2269_v43 = vpack.c.bf16 %v2249_v17, %v2248_v22 }
 0x24d   :  { %2716 = vmatmul.mubr.bf16.gmra.mrb[12].mxu1 %v2267_v19  ;;  %3716 = vmatprep.mubr.bf16.mxu0 %v2254_v58 }
 0x254   :  { %3717 = vmatmul.mubr.bf16.vlgmr.msra.gmra.mrb[112].mxu0 %v2259_v20 }
 0x255   :  { %3720 = vmatprep.mubr.bf16.mxu0 %v2264_v21 }
 0x25c   :  { %3721 = vmatmul.mubr.bf16.gmra.mrb[116].mxu0 %v2269_v43 }
 0x2e4   :  { %v3602_v48 = vpop.f32.mrb[96].mxu0 }
 0x2e5   :  { %v3642_v50 = vpop.f32.mrb[0].mxu1  ;;  %v3603_v24 = vpop.f32.mrb[97].mxu0 }
 0x2e6   :  { %v3643_v11 = vpop.f32.mrb[1].mxu1  ;;  %v3604_v51 = vadd.f32 %v3603_v24, %v3602_v48  ;;  %v3605_v56 = vpop.f32.mrb[98].mxu0 }
 0x2e7   :  { %v3644_v54 = vadd.f32 %v3643_v11, %v3642_v50  ;;  %v3645_v55 = vpop.f32.mrb[2].mxu1  ;;  %v3606_v57 = vpop.f32.mrb[99].mxu0 }
 0x2e8   :  { %v3646_v42 = vpop.f32.mrb[3].mxu1  ;;  %v2629_v59 = vadd.f32 %v3604_v51, %v2353_v8  ;;  %v3607_v63 = vadd.f32 %v3606_v57, %v3605_v56 }
 0x2e9   :  { %v3647_v45 = vadd.f32 %v3646_v42, %v3645_v55 }
 0x2ea   :  { %v2632_v12 = vadd.f32 %v3607_v63, %v2353_v8  ;;  %v2694_v16 = vadd.f32 %v3644_v54, %v2629_v59 }
 0x2ec   :  { %v2697_v2 = vadd.f32 %v3647_v45, %v2632_v12 }
 0x2ff   :  { %v3608_v0 = vpop.f32.mrb[100].mxu0 }
 0x300   :  { %v3648_v47 = vpop.f32.mrb[4].mxu1  ;;  %v3609_v4 = vpop.f32.mrb[101].mxu0 }
 0x301   :  { %v3649_v6 = vpop.f32.mrb[5].mxu1  ;;  %v3610_v15 = vadd.f32 %v3609_v4, %v3608_v0  ;;  %v3611_v60 = vpop.f32.mrb[102].mxu0 }
 0x302   :  { %v3650_v18 = vadd.f32 %v3649_v6, %v3648_v47  ;;  %v3651_v52 = vpop.f32.mrb[6].mxu1  ;;  %v3612_v7 = vpop.f32.mrb[103].mxu0 }
 0x303   :  { %v3652_v9 = vpop.f32.mrb[7].mxu1  ;;  %v2637_v41 = vadd.f32 %v3610_v15, %v2353_v8  ;;  %v3613_v10 = vadd.f32 %v3612_v7, %v3611_v60 }
 0x304   :  { %v3653_v1 = vadd.f32 %v3652_v9, %v3651_v52 }
 0x305   :  { %v2640_v13 = vadd.f32 %v3613_v10, %v2353_v8  ;;  %v2702_v5 = vadd.f32 %v3650_v18, %v2637_v41 }
 0x307   :  { %v2705_v49 = vadd.f32 %v3653_v1, %v2640_v13 }
 0x317   :  { %v3614_v19 = vpop.f32.mrb[104].mxu0 }
 0x318   :  { %v3654_v58 = vpop.f32.mrb[8].mxu1  ;;  %v3615_v14 = vpop.f32.mrb[105].mxu0 }
 0x319   :  { %v3655_v62 = vpop.f32.mrb[9].mxu1  ;;  %v3616_v53 = vadd.f32 %v3615_v14, %v3614_v19  ;;  %v3617_v3 = vpop.f32.mrb[106].mxu0 }
 0x31a   :  { %v3656_v20 = vadd.f32 %v3655_v62, %v3654_v58  ;;  %v3657_v21 = vpop.f32.mrb[10].mxu1  ;;  %v3618_v22 = vpop.f32.mrb[107].mxu0 }
 0x31b   :  { %v3658_v17 = vpop.f32.mrb[11].mxu1  ;;  %v2645_v43 = vadd.f32 %v3616_v53, %v2353_v8  ;;  %v3619_v44 = vadd.f32 %v3618_v22, %v3617_v3 }
 0x31c   :  { %v3659_v48 = vadd.f32 %v3658_v17, %v3657_v21 }
 0x31d   :  { %v2648_v50 = vadd.f32 %v3619_v44, %v2353_v8  ;;  %v2710_v24 = vadd.f32 %v3656_v20, %v2645_v43 }
 0x31f   :  { %v3620_v11 = vpop.f32.mrb[108].mxu0  ;;  %v2713_v51 = vadd.f32 %v3659_v48, %v2648_v50 }
 0x320   :  { %v3660_v54 = vpop.f32.mrb[12].mxu1  ;;  %v3621_v56 = vpop.f32.mrb[109].mxu0 }
 0x321   :  { %v3622_v55 = vadd.f32 %v3621_v56, %v3620_v11  ;;  %v3661_v57 = vpop.f32.mrb[13].mxu1  ;;  %v3623_v42 = vpop.f32.mrb[110].mxu0 }
 0x322   :  { %v3662_v59 = vadd.f32 %v3661_v57, %v3660_v54  ;;  %v3663_v63 = vpop.f32.mrb[14].mxu1  ;;  %v3624_v45 = vpop.f32.mrb[111].mxu0 }
 0x323   :  { %v2653_v12 = vadd.f32 %v3622_v55, %v2353_v8  ;;  %v3625_v0 = vadd.f32 %v3624_v45, %v3623_v42  ;;  %v3664_v47 = vpop.f32.mrb[15].mxu1 }
 0x324   :  { %v3665_v4 = vadd.f32 %v3664_v47, %v3663_v63 }
 0x325   :  { %v2656_v6 = vadd.f32 %v3625_v0, %v2353_v8  ;;  %v2718_v15 = vadd.f32 %v3662_v59, %v2653_v12 }
 0x327   :  { %v3718_v18 = vpop.f32.mrb[112].mxu0  ;;  %v2721_v60 = vadd.f32 %v3665_v4, %v2656_v6 }
 0x328   :  { %v2767_v52 = vadd.f32 %v3718_v18, %v2702_v5  ;;  %v2758_v7 = vpop.f32.mrb[113].mxu0 }
 0x329   :  { %v2759_v9 = vadd.f32 %v2758_v7, %v2694_v16  ;;  %v3719_v41 = vpop.f32.mrb[114].mxu0 }
 0x32a   :  { %v2791_v10 = vmax.f32 %v2767_v52, 0.0  ;;  %v2770_v1 = vadd.f32 %v3719_v41, %v2705_v49  ;;  %v2761_v13 = vpop.f32.mrb[115].mxu0 }
 0x32b   :  { %v2789_v19 = vmax.f32 %v2759_v9, 0.0  ;;  %v2762_v58 = vadd.f32 %v2761_v13, %v2697_v2 }
 0x32c   :  { %2799 = vst [vmem:[#allocation4 + $0x10] sm:$0xff] %v2791_v10  ;;  %v2792_v14 = vmax.f32 %v2770_v1, 0.0 }
 0x32d   :  { %2797 = vst [vmem:[#allocation4] sm:$0xff] %v2789_v19  ;;  %v2790_v62 = vmax.f32 %v2762_v58, 0.0 }
 0x32e   :  { %2800 = vst [vmem:[#allocation4 + $0x18] sm:$0xff] %v2792_v14 }
 0x32f   :  { %2798 = vst [vmem:[#allocation4 + $0x8] sm:$0xff] %v2790_v62  ;;  %v3722_v53 = vpop.f32.mrb[116].mxu0 }
 0x330   :  { %v2783_v8 = vadd.f32 %v3722_v53, %v2718_v15  ;;  %v2774_v20 = vpop.f32.mrb[117].mxu0 }
 0x331   :  { %v2775_v3 = vadd.f32 %v2774_v20, %v2710_v24  ;;  %v3723_v21 = vpop.f32.mrb[118].mxu0 }
 0x332   :  { %v2795_v5 = vmax.f32 %v2783_v8, 0.0  ;;  %v2786_v22 = vadd.f32 %v3723_v21, %v2721_v60  ;;  %v2777_v16 = vpop.f32.mrb[119].mxu0 }
 0x333   :  { %v2793_v17 = vmax.f32 %v2775_v3, 0.0  ;;  %v2778_v43 = vadd.f32 %v2777_v16, %v2713_v51 }
 0x334   :  { %2803 = vst [vmem:[#allocation4 + $0x30] sm:$0xff] %v2795_v5  ;;  %v2796_v49 = vmax.f32 %v2786_v22, 0.0 }
 0x335   :  { %v2807_v44 = vld [vmem:[#allocation4 + $0x18] ss:$3 sm:$0x1]  ;;  %v2811_v2 = vld [vmem:[#allocation4 + $0x19] ss:$3 sm:$0x1] }
 0x336   :  { %2801 = vst [vmem:[#allocation4 + $0x20] sm:$0xff] %v2793_v17  ;;  %v2813_v48 = vmax.f32 %v2807_v44, %v2811_v2  ;;  %v2805_v50 = vld [vmem:[#allocation4] ss:$3 sm:$0xff]  ;;  %2804 = vst [vmem:[#allocation4 + $0x38] sm:$0x3] %v2796_v49  ;;  %v2794_v11 = vmax.f32 %v2778_v43, 0.0 }
 0x337   :  { %v2817_v54 = vld [vmem:[#allocation4 + $0x1a] ss:$3 sm:$0x1]  ;;  %v2809_v56 = vld [vmem:[#allocation4 + $0x1] ss:$3 sm:$0xff] }
 0x338   :  { %v2819_v55 = vmax.f32 %v2813_v48, %v2817_v54  ;;  %v2812_v57 = vmax.f32 %v2805_v50, %v2809_v56  ;;  %2802 = vst [vmem:[#allocation4 + $0x28] sm:$0xff] %v2794_v11  ;;  %v2815_v24 = vld [vmem:[#allocation4 + $0x2] ss:$3 sm:$0xff] }
 0x33a   :  { %2821 = vst [vmem:[#allocation5 + $0x8] sm:$0x1] %v2819_v55  ;;  %v2818_v42 = vmax.f32 %v2812_v57, %v2815_v24 }
 0x33b   :  { %v2825_v59 = vld [vmem:[#allocation4 + $0x37] ss:$3 sm:$0x1] }
 0x33c   :  { %2820 = vst [vmem:[#allocation5] sm:$0xff] %v2818_v42 }
 0x33d   :  { %v2829_v51 = vld [vmem:[#allocation4 + $0x38] ss:$3 sm:$0x1]  ;;  %v2835_v45 = vld [vmem:[#allocation4 + $0x39] ss:$3 sm:$0x1] }
 0x33e   :  { %v2831_v63 = vmax.f32 %v2825_v59, %v2829_v51 }
 0x33f   :  { %v2823_v12 = vld [vmem:[#allocation4 + $0x1f] ss:$3 sm:$0xff]  ;;  %v2827_v0 = vld [vmem:[#allocation4 + $0x20] ss:$3 sm:$0xff]  ;;  %v2833_v6 = vld [vmem:[#allocation4 + $0x21] ss:$3 sm:$0xff] }
 0x340   :  { %v2837_v47 = vmax.f32 %v2831_v63, %v2835_v45  ;;  %v2830_v4 = vmax.f32 %v2823_v12, %v2827_v0 }
 0x342   :  { %2839 = vst [vmem:[#allocation5 + $0x11] sm:$0x1] %v2837_v47  ;;  %v2836_v15 = vmax.f32 %v2830_v4, %v2833_v6 }
 0x344   :  { %2838 = vst [vmem:[#allocation5 + $0x9] sm:$0xff] %v2836_v15 }
 0x345   :  { %3910 = dma.done.wait [#allocation8], 18432 }
 0x346   :  { %3911 = vsyncadd [#allocation8], 4294948864  ;;  %v2871_v18 = vld [vmem:[#allocation6 + $0x8] sm:$0xff]  ;;  %v2870_v60 = vld [vmem:[#allocation6] sm:$0xff]  ;;  %3678 = vmatprep.subr.bf16.mxu0 %v4642_v33 }
 0x347   :  { %v2873_v52 = vld [vmem:[#allocation6 + $0x18] sm:$0xff]  ;;  %3033 = vmatprep.subr.bf16.mxu1 %v2871_v18  ;;  %v2872_v7 = vld [vmem:[#allocation6 + $0x10] sm:$0xff]  ;;  %v2875_v9 = vld [vmem:[#allocation6 + $0x28] sm:$0xff] }
 0x348   :  { %3034 = vmatpush1.bf16.msra.mxu1 %v2870_v60  ;;  %v2874_v41 = vld [vmem:[#allocation6 + $0x20] sm:$0xff]  ;;  %v2877_v10 = vld [vmem:[#allocation6 + $0x38] sm:$0xff]  ;;  %v2876_v13 = vld [vmem:[#allocation6 + $0x30] sm:$0xff] }
 0x349   :  { %3035 = vmatprep.subr.bf16.mxu1 %v2873_v52  ;;  %v2879_v58 = vld [vmem:[#allocation6 + $0x48] sm:$0xff]  ;;  %v2878_v14 = vld [vmem:[#allocation6 + $0x40] sm:$0xff]  ;;  %v2881_v62 = vld [vmem:[#allocation6 + $0x58] sm:$0xff] }
 0x34a   :  { %v2880_v53 = vld [vmem:[#allocation6 + $0x50] sm:$0xff]  ;;  %v2883_v8 = vld [vmem:[#allocation6 + $0x68] sm:$0xff]  ;;  %v2882_v20 = vld [vmem:[#allocation6 + $0x60] sm:$0xff] }
 0x34b   :  { %v2846_v1 = vld [vmem:[#allocation5 + $0x1] ss:$9 sm:$0x3]  ;;  %v2885_v3 = vld [vmem:[#allocation6 + $0x78] sm:$0xff]  ;;  %v2886_v22 = vld [vmem:[#allocation6 + $0x80] sm:$0xff] }
 0x34c   :  { %3036 = vmatpush1.bf16.msra.mxu1 %v2872_v7  ;;  %v2862_v19 = vpack.c.bf16 %v2846_v1, %v2846_v1  ;;  %v2884_v21 = vld [vmem:[#allocation6 + $0x70] sm:$0xff]  ;;  %v2887_v5 = vld [vmem:[#allocation6 + $0x88] sm:$0xff]  ;;  %v2889_v16 = vld [vmem:[#allocation6 + $0x98] sm:$0xff] }
 0x34d   :  { %3037 = vmatprep.subr.bf16.mxu1 %v2875_v9  ;;  %v2888_v17 = vld [vmem:[#allocation6 + $0x90] sm:$0xff]  ;;  %v2891_v43 = vld [vmem:[#allocation6 + $0xa8] sm:$0xff]  ;;  %v2890_v49 = vld [vmem:[#allocation6 + $0xa0] sm:$0xff] }
 0x34e   :  { %3065 = vmatprep.mubr.bf16.mxu1 %v2862_v19  ;;  %v2893_v44 = vld [vmem:[#allocation6 + $0xb8] sm:$0xff]  ;;  %v2892_v2 = vld [vmem:[#allocation6 + $0xb0] sm:$0xff]  ;;  %v2895_v48 = vld [vmem:[#allocation6 + $0xc8] sm:$0xff] }
 0x34f   :  { %v2894_v50 = vld [vmem:[#allocation6 + $0xc0] sm:$0xff]  ;;  %v2897_v11 = vld [vmem:[#allocation6 + $0xd8] sm:$0xff]  ;;  %v2896_v54 = vld [vmem:[#allocation6 + $0xd0] sm:$0xff] }
 0x350   :  { %3038 = vmatpush1.bf16.msra.mxu1 %v2874_v41  ;;  %v2899_v56 = vld [vmem:[#allocation6 + $0xe8] sm:$0xff]  ;;  %v2898_v55 = vld [vmem:[#allocation6 + $0xe0] sm:$0xff]  ;;  %v2901_v57 = vld [vmem:[#allocation6 + $0xf8] sm:$0xff] }
 0x351   :  { %3039 = vmatprep.subr.bf16.mxu1 %v2877_v10  ;;  %v2844_v24 = vld [vmem:[#allocation5] ss:$9 sm:$0x3]  ;;  %v2850_v59 = vld [vmem:[#allocation5 + $0x3] ss:$9 sm:$0x3] }
 0x352   :  { %v2900_v42 = vld [vmem:[#allocation6 + $0xf0] sm:$0xff]  ;;  %v2903_v51 = vld [vmem:[#allocation6 + $0x108] sm:$0xff]  ;;  %v2861_v63 = vpack.c.bf16 %v2844_v24, %v2844_v24  ;;  %v2864_v45 = vpack.c.bf16 %v2850_v59, %v2850_v59  ;;  %v2902_v12 = vld [vmem:[#allocation6 + $0x100] sm:$0xff] }
 0x353   :  { %v2905_v0 = vld [vmem:[#allocation6 + $0x118] sm:$0xff]  ;;  %v2904_v47 = vld [vmem:[#allocation6 + $0x110] sm:$0xff]  ;;  %v2907_v4 = vld [vmem:[#allocation6 + $0x128] sm:$0xff] }
 0x354   :  { %3040 = vmatpush1.bf16.msra.mxu1 %v2876_v13  ;;  %v2906_v6 = vld [vmem:[#allocation6 + $0x120] sm:$0xff]  ;;  %v2909_v15 = vld [vmem:[#allocation6 + $0x138] sm:$0xff]  ;;  %v2908_v18 = vld [vmem:[#allocation6 + $0x130] sm:$0xff] }
 0x355   :  { %3041 = vmatprep.subr.bf16.mxu1 %v2879_v58  ;;  %v2911_v60 = vld [vmem:[#allocation6 + $0x148] sm:$0xff]  ;;  %v2910_v52 = vld [vmem:[#allocation6 + $0x140] sm:$0xff]  ;;  %v2913_v7 = vld [vmem:[#allocation6 + $0x158] sm:$0xff] }
 0x356   :  { %v2912_v9 = vld [vmem:[#allocation6 + $0x150] sm:$0xff]  ;;  %v2915_v41 = vld [vmem:[#allocation6 + $0x168] sm:$0xff]  ;;  %v2914_v10 = vld [vmem:[#allocation6 + $0x160] sm:$0xff] }
 0x357   :  { %v2917_v1 = vld [vmem:[#allocation6 + $0x178] sm:$0xff]  ;;  %v2916_v13 = vld [vmem:[#allocation6 + $0x170] sm:$0xff]  ;;  %v2919_v19 = vld [vmem:[#allocation6 + $0x188] sm:$0xff] }
 0x358   :  { %3042 = vmatpush1.bf16.msra.mxu1 %v2878_v14  ;;  %v2918_v58 = vld [vmem:[#allocation6 + $0x180] sm:$0xff]  ;;  %v2921_v14 = vld [vmem:[#allocation6 + $0x198] sm:$0xff]  ;;  %v2939_v24 = vld [vmem:[#allocation6 + $0x228] sm:$0xff] }
 0x359   :  { %3043 = vmatprep.subr.bf16.mxu1 %v2881_v62  ;;  %v2920_v62 = vld [vmem:[#allocation6 + $0x190] sm:$0xff]  ;;  %v2941_v59 = vld [vmem:[#allocation6 + $0x238] sm:$0xff] }
 0x35c   :  { %3044 = vmatpush1.bf16.msra.mxu1 %v2880_v53  ;;  %v2923_v53 = vld [vmem:[#allocation6 + $0x1a8] sm:$0xff] }
 0x35d   :  { %3045 = vmatprep.subr.bf16.mxu1 %v2883_v8  ;;  %v2922_v8 = vld [vmem:[#allocation6 + $0x1a0] sm:$0xff] }
 0x360   :  { %3046 = vmatpush1.bf16.msra.mxu1 %v2882_v20  ;;  %v2925_v20 = vld [vmem:[#allocation6 + $0x1b8] sm:$0xff] }
 0x361   :  { %3047 = vmatprep.subr.bf16.mxu1 %v2885_v3  ;;  %v2924_v3 = vld [vmem:[#allocation6 + $0x1b0] sm:$0xff] }
 0x364   :  { %3048 = vmatpush1.bf16.msra.mxu1 %v2884_v21  ;;  %v2927_v21 = vld [vmem:[#allocation6 + $0x1c8] sm:$0xff] }
 0x365   :  { %3049 = vmatprep.subr.bf16.mxu1 %v2887_v5  ;;  %v2926_v5 = vld [vmem:[#allocation6 + $0x1c0] sm:$0xff] }
 0x368   :  { %3050 = vmatpush1.bf16.msra.mxu1 %v2886_v22  ;;  %v2929_v22 = vld [vmem:[#allocation6 + $0x1d8] sm:$0xff] }
 0x369   :  { %3051 = vmatprep.subr.bf16.mxu1 %v2889_v16  ;;  %v2928_v16 = vld [vmem:[#allocation6 + $0x1d0] sm:$0xff] }
 0x36c   :  { %3052 = vmatpush1.bf16.msra.mxu1 %v2888_v17  ;;  %v2931_v17 = vld [vmem:[#allocation6 + $0x1e8] sm:$0xff] }
 0x36d   :  { %3053 = vmatprep.subr.bf16.mxu1 %v2891_v43  ;;  %v2930_v43 = vld [vmem:[#allocation6 + $0x1e0] sm:$0xff] }
 0x370   :  { %3054 = vmatpush1.bf16.msra.mxu1 %v2890_v49  ;;  %v2933_v49 = vld [vmem:[#allocation6 + $0x1f8] sm:$0xff] }
 0x371   :  { %3055 = vmatprep.subr.bf16.mxu1 %v2893_v44  ;;  %v2848_v44 = vld [vmem:[#allocation5 + $0x2] ss:$9 sm:$0x3] }
 0x374   :  { %3056 = vmatpush1.bf16.msra.mxu1 %v2892_v2  ;;  %v2932_v2 = vld [vmem:[#allocation6 + $0x1f0] sm:$0xff] }
 0x375   :  { %3057 = vmatprep.subr.bf16.mxu1 %v2895_v48  ;;  %v2854_v48 = vld [vmem:[#allocation5 + $0x5] ss:$9 sm:$0x3] }
 0x378   :  { %3058 = vmatpush1.bf16.msra.mxu1 %v2894_v50  ;;  %v2935_v50 = vld [vmem:[#allocation6 + $0x208] sm:$0xff] }
 0x379   :  { %3059 = vmatprep.subr.bf16.mxu1 %v2897_v11  ;;  %v2863_v11 = vpack.c.bf16 %v2848_v44, %v2848_v44  ;;  %v2971_v44 = vld [vmem:[#allocation6 + $0x328] sm:$0xff] }
 0x37c   :  { %3060 = vmatpush1.bf16.msra.mxu1 %v2896_v54  ;;  %v2866_v54 = vpack.c.bf16 %v2854_v48, %v2854_v48  ;;  %v2973_v48 = vld [vmem:[#allocation6 + $0x338] sm:$0xff] }
 0x37d   :  { %3061 = vmatprep.subr.bf16.mxu1 %v2899_v56  ;;  %v2934_v56 = vld [vmem:[#allocation6 + $0x200] sm:$0xff] }
 0x380   :  { %3062 = vmatpush1.bf16.msra.mxu1 %v2898_v55  ;;  %v2937_v55 = vld [vmem:[#allocation6 + $0x218] sm:$0xff] }
 0x381   :  { %3063 = vmatprep.subr.bf16.mxu1 %v2901_v57  ;;  %v2936_v57 = vld [vmem:[#allocation6 + $0x210] sm:$0xff] }
 0x384   :  { %3064 = vmatpush1.bf16.msra.mxu1 %v2900_v42  ;;  %v2938_v42 = vld [vmem:[#allocation6 + $0x220] sm:$0xff] }
 0x385   :  { %3074 = vmatprep.subr.bf16.mxu1 %v2903_v51  ;;  %v2940_v51 = vld [vmem:[#allocation6 + $0x230] sm:$0xff] }
 0x387   :  { %3066 = vmatmul.mubr.bf16.vlgmr.msra.gmra.mrb[16].mxu1 %v2861_v63  ;;  %v2943_v63 = vld [vmem:[#allocation6 + $0x248] sm:$0xff] }
 0x388   :  { %3075 = vmatpush1.bf16.msra.mxu1 %v2902_v12  ;;  %3106 = vmatprep.mubr.bf16.mxu1 %v2864_v45  ;;  %v2942_v45 = vld [vmem:[#allocation6 + $0x240] sm:$0xff]  ;;  %v2945_v12 = vld [vmem:[#allocation6 + $0x258] sm:$0xff] }
 0x389   :  { %3076 = vmatprep.subr.bf16.mxu1 %v2905_v0  ;;  %v2944_v0 = vld [vmem:[#allocation6 + $0x250] sm:$0xff] }
 0x38c   :  { %3077 = vmatpush1.bf16.msra.mxu1 %v2904_v47  ;;  %v2947_v47 = vld [vmem:[#allocation6 + $0x268] sm:$0xff] }
 0x38d   :  { %3078 = vmatprep.subr.bf16.mxu1 %v2907_v4  ;;  %v2946_v4 = vld [vmem:[#allocation6 + $0x260] sm:$0xff] }
 0x390   :  { %3079 = vmatpush1.bf16.msra.mxu1 %v2906_v6  ;;  %v2949_v6 = vld [vmem:[#allocation6 + $0x278] sm:$0xff] }
 0x391   :  { %3080 = vmatprep.subr.bf16.mxu1 %v2909_v15  ;;  %v2948_v15 = vld [vmem:[#allocation6 + $0x270] sm:$0xff] }
 0x394   :  { %3081 = vmatpush1.bf16.msra.mxu1 %v2908_v18  ;;  %v2951_v18 = vld [vmem:[#allocation6 + $0x288] sm:$0xff] }
 0x395   :  { %3082 = vmatprep.subr.bf16.mxu1 %v2911_v60  ;;  %v2950_v60 = vld [vmem:[#allocation6 + $0x280] sm:$0xff] }
 0x398   :  { %3083 = vmatpush1.bf16.msra.mxu1 %v2910_v52  ;;  %v2953_v52 = vld [vmem:[#allocation6 + $0x298] sm:$0xff] }
 0x399   :  { %3084 = vmatprep.subr.bf16.mxu1 %v2913_v7  ;;  %v2952_v7 = vld [vmem:[#allocation6 + $0x290] sm:$0xff] }
 0x39c   :  { %3085 = vmatpush1.bf16.msra.mxu1 %v2912_v9  ;;  %v2955_v9 = vld [vmem:[#allocation6 + $0x2a8] sm:$0xff] }
 0x39d   :  { %3086 = vmatprep.subr.bf16.mxu1 %v2915_v41  ;;  %v2954_v41 = vld [vmem:[#allocation6 + $0x2a0] sm:$0xff] }
 0x3a0   :  { %3087 = vmatpush1.bf16.msra.mxu1 %v2914_v10  ;;  %v2957_v10 = vld [vmem:[#allocation6 + $0x2b8] sm:$0xff] }
 0x3a1   :  { %3088 = vmatprep.subr.bf16.mxu1 %v2917_v1  ;;  %v2956_v1 = vld [vmem:[#allocation6 + $0x2b0] sm:$0xff] }
 0x3a4   :  { %3089 = vmatpush1.bf16.msra.mxu1 %v2916_v13  ;;  %v2959_v13 = vld [vmem:[#allocation6 + $0x2c8] sm:$0xff] }
 0x3a5   :  { %3090 = vmatprep.subr.bf16.mxu1 %v2919_v19  ;;  %v2958_v19 = vld [vmem:[#allocation6 + $0x2c0] sm:$0xff] }
 0x3a8   :  { %3091 = vmatpush1.bf16.msra.mxu1 %v2918_v58  ;;  %v2961_v58 = vld [vmem:[#allocation6 + $0x2d8] sm:$0xff] }
 0x3a9   :  { %3092 = vmatprep.subr.bf16.mxu1 %v2921_v14  ;;  %v2960_v14 = vld [vmem:[#allocation6 + $0x2d0] sm:$0xff] }
 0x3ac   :  { %3093 = vmatpush1.bf16.msra.mxu1 %v2920_v62  ;;  %v2963_v62 = vld [vmem:[#allocation6 + $0x2e8] sm:$0xff] }
 0x3ad   :  { %3094 = vmatprep.subr.bf16.mxu1 %v2923_v53  ;;  %v2962_v53 = vld [vmem:[#allocation6 + $0x2e0] sm:$0xff] }
 0x3b0   :  { %3095 = vmatpush1.bf16.msra.mxu1 %v2922_v8  ;;  %v2965_v8 = vld [vmem:[#allocation6 + $0x2f8] sm:$0xff] }
 0x3b1   :  { %3096 = vmatprep.subr.bf16.mxu1 %v2925_v20  ;;  %v2852_v20 = vld [vmem:[#allocation5 + $0x4] ss:$9 sm:$0x3] }
 0x3b4   :  { %3097 = vmatpush1.bf16.msra.mxu1 %v2924_v3  ;;  %v2964_v3 = vld [vmem:[#allocation6 + $0x2f0] sm:$0xff] }
 0x3b5   :  { %3098 = vmatprep.subr.bf16.mxu1 %v2927_v21  ;;  %v2858_v21 = vld [vmem:[#allocation5 + $0x7] ss:$9 sm:$0x3] }
 0x3b8   :  { %3099 = vmatpush1.bf16.msra.mxu1 %v2926_v5  ;;  %v2967_v5 = vld [vmem:[#allocation6 + $0x308] sm:$0xff] }
 0x3b9   :  { %3100 = vmatprep.subr.bf16.mxu1 %v2929_v22  ;;  %v2865_v22 = vpack.c.bf16 %v2852_v20, %v2852_v20  ;;  %v3005_v20 = vld [vmem:[#allocation6 + $0x438] sm:$0xff] }
 0x3bc   :  { %3101 = vmatpush1.bf16.msra.mxu1 %v2928_v16  ;;  %v2868_v16 = vpack.c.bf16 %v2858_v21, %v2858_v21  ;;  %v3007_v21 = vld [vmem:[#allocation6 + $0x448] sm:$0xff] }
 0x3bd   :  { %3102 = vmatprep.subr.bf16.mxu1 %v2931_v17  ;;  %v2966_v17 = vld [vmem:[#allocation6 + $0x300] sm:$0xff] }
 0x3c0   :  { %3103 = vmatpush1.bf16.msra.mxu1 %v2930_v43  ;;  %v2969_v43 = vld [vmem:[#allocation6 + $0x318] sm:$0xff] }
 0x3c1   :  { %3104 = vmatprep.subr.bf16.mxu1 %v2933_v49  ;;  %v2968_v49 = vld [vmem:[#allocation6 + $0x310] sm:$0xff] }
 0x3c4   :  { %3105 = vmatpush1.bf16.msra.mxu1 %v2932_v2  ;;  %v2970_v2 = vld [vmem:[#allocation6 + $0x320] sm:$0xff] }
 0x3c5   :  { %3115 = vmatprep.subr.bf16.mxu1 %v2935_v50  ;;  %v2972_v50 = vld [vmem:[#allocation6 + $0x330] sm:$0xff] }
 0x3c7   :  { %3107 = vmatmul.mubr.bf16.vlgmr.msra.gmra.mrb[16].mxu1 %v2863_v11  ;;  %v2975_v11 = vld [vmem:[#allocation6 + $0x348] sm:$0xff] }
 0x3c8   :  { %3116 = vmatpush1.bf16.msra.mxu1 %v2934_v56  ;;  %3147 = vmatprep.mubr.bf16.mxu1 %v2866_v54  ;;  %v2974_v54 = vld [vmem:[#allocation6 + $0x340] sm:$0xff]  ;;  %v2977_v56 = vld [vmem:[#allocation6 + $0x358] sm:$0xff] }
 0x3c9   :  { %3117 = vmatprep.subr.bf16.mxu1 %v2937_v55  ;;  %v2976_v55 = vld [vmem:[#allocation6 + $0x350] sm:$0xff] }
 0x3cc   :  { %3118 = vmatpush1.bf16.msra.mxu1 %v2936_v57  ;;  %v2979_v57 = vld [vmem:[#allocation6 + $0x368] sm:$0xff] }
 0x3cd   :  { %3119 = vmatprep.subr.bf16.mxu1 %v2939_v24  ;;  %v2978_v24 = vld [vmem:[#allocation6 + $0x360] sm:$0xff] }
 0x3d0   :  { %3120 = vmatpush1.bf16.msra.mxu1 %v2938_v42  ;;  %v2981_v42 = vld [vmem:[#allocation6 + $0x378] sm:$0xff] }
 0x3d1   :  { %3121 = vmatprep.subr.bf16.mxu1 %v2941_v59  ;;  %v2980_v59 = vld [vmem:[#allocation6 + $0x370] sm:$0xff] }
 0x3d4   :  { %3122 = vmatpush1.bf16.msra.mxu1 %v2940_v51  ;;  %v2983_v51 = vld [vmem:[#allocation6 + $0x388] sm:$0xff] }
 0x3d5   :  { %3123 = vmatprep.subr.bf16.mxu1 %v2943_v63  ;;  %v2982_v63 = vld [vmem:[#allocation6 + $0x380] sm:$0xff] }
 0x3d8   :  { %3124 = vmatpush1.bf16.msra.mxu1 %v2942_v45  ;;  %v2985_v45 = vld [vmem:[#allocation6 + $0x398] sm:$0xff] }
 0x3d9   :  { %3125 = vmatprep.subr.bf16.mxu1 %v2945_v12  ;;  %v2984_v12 = vld [vmem:[#allocation6 + $0x390] sm:$0xff] }
 0x3dc   :  { %3126 = vmatpush1.bf16.msra.mxu1 %v2944_v0  ;;  %v2987_v0 = vld [vmem:[#allocation6 + $0x3a8] sm:$0xff] }
 0x3dd   :  { %3127 = vmatprep.subr.bf16.mxu1 %v2947_v47  ;;  %v2986_v47 = vld [vmem:[#allocation6 + $0x3a0] sm:$0xff] }
 0x3e0   :  { %3128 = vmatpush1.bf16.msra.mxu1 %v2946_v4  ;;  %v2989_v4 = vld [vmem:[#allocation6 + $0x3b8] sm:$0xff] }
 0x3e1   :  { %3129 = vmatprep.subr.bf16.mxu1 %v2949_v6  ;;  %v2988_v6 = vld [vmem:[#allocation6 + $0x3b0] sm:$0xff] }
 0x3e4   :  { %3130 = vmatpush1.bf16.msra.mxu1 %v2948_v15  ;;  %v2991_v15 = vld [vmem:[#allocation6 + $0x3c8] sm:$0xff] }
 0x3e5   :  { %3131 = vmatprep.subr.bf16.mxu1 %v2951_v18  ;;  %v2990_v18 = vld [vmem:[#allocation6 + $0x3c0] sm:$0xff] }
 0x3e8   :  { %3132 = vmatpush1.bf16.msra.mxu1 %v2950_v60  ;;  %v2993_v60 = vld [vmem:[#allocation6 + $0x3d8] sm:$0xff] }
 0x3e9   :  { %3133 = vmatprep.subr.bf16.mxu1 %v2953_v52  ;;  %v2992_v52 = vld [vmem:[#allocation6 + $0x3d0] sm:$0xff] }
 0x3ec   :  { %3134 = vmatpush1.bf16.msra.mxu1 %v2952_v7  ;;  %v2995_v7 = vld [vmem:[#allocation6 + $0x3e8] sm:$0xff] }
 0x3ed   :  { %3135 = vmatprep.subr.bf16.mxu1 %v2955_v9  ;;  %v2994_v9 = vld [vmem:[#allocation6 + $0x3e0] sm:$0xff] }
 0x3f0   :  { %3136 = vmatpush1.bf16.msra.mxu1 %v2954_v41  ;;  %v2997_v41 = vld [vmem:[#allocation6 + $0x3f8] sm:$0xff] }
 0x3f1   :  { %3137 = vmatprep.subr.bf16.mxu1 %v2957_v10  ;;  %v2856_v10 = vld [vmem:[#allocation5 + $0x6] ss:$9 sm:$0x3] }
 0x3f4   :  { %3138 = vmatpush1.bf16.msra.mxu1 %v2956_v1  ;;  %v2996_v1 = vld [vmem:[#allocation6 + $0x3f0] sm:$0xff] }
 0x3f5   :  { %3139 = vmatprep.subr.bf16.mxu1 %v2959_v13  ;;  %v2999_v13 = vld [vmem:[#allocation6 + $0x408] sm:$0xff] }
 0x3f8   :  { %3140 = vmatpush1.bf16.msra.mxu1 %v2958_v19  ;;  %v2867_v19 = vpack.c.bf16 %v2856_v10, %v2856_v10 }
 0x3f9   :  { %3141 = vmatprep.subr.bf16.mxu1 %v2961_v58  ;;  %v2998_v58 = vld [vmem:[#allocation6 + $0x400] sm:$0xff] }
 0x3fc   :  { %3142 = vmatpush1.bf16.msra.mxu1 %v2960_v14  ;;  %v3001_v14 = vld [vmem:[#allocation6 + $0x418] sm:$0xff] }
 0x3fd   :  { %3143 = vmatprep.subr.bf16.mxu1 %v2963_v62  ;;  %v3000_v62 = vld [vmem:[#allocation6 + $0x410] sm:$0xff] }
 0x400   :  { %3144 = vmatpush1.bf16.msra.mxu1 %v2962_v53  ;;  %v3003_v53 = vld [vmem:[#allocation6 + $0x428] sm:$0xff] }
 0x401   :  { %3145 = vmatprep.subr.bf16.mxu1 %v2965_v8  ;;  %v3002_v8 = vld [vmem:[#allocation6 + $0x420] sm:$0xff] }
 0x404   :  { %3146 = vmatpush1.bf16.msra.mxu1 %v2964_v3  ;;  %v3004_v3 = vld [vmem:[#allocation6 + $0x430] sm:$0xff] }
 0x405   :  { %3156 = vmatprep.subr.bf16.mxu1 %v2967_v5  ;;  %v3006_v5 = vld [vmem:[#allocation6 + $0x440] sm:$0xff] }
 0x407   :  { %3148 = vmatmul.mubr.bf16.vlgmr.msra.gmra.mrb[16].mxu1 %v2865_v22  ;;  %v3009_v22 = vld [vmem:[#allocation6 + $0x458] sm:$0xff] }
 0x408   :  { %3157 = vmatpush1.bf16.msra.mxu1 %v2966_v17  ;;  %3188 = vmatprep.mubr.bf16.mxu1 %v2868_v16  ;;  %v3008_v16 = vld [vmem:[#allocation6 + $0x450] sm:$0xff]  ;;  %v3011_v17 = vld [vmem:[#allocation6 + $0x468] sm:$0xff] }
 0x409   :  { %3158 = vmatprep.subr.bf16.mxu1 %v2969_v43  ;;  %v3013_v43 = vld [vmem:[#allocation6 + $0x478] sm:$0xff] }
 0x40c   :  { %3159 = vmatpush1.bf16.msra.mxu1 %v2968_v49  ;;  %v2860_v49 = vld [vmem:[#allocation5 + $0x8] ss:$9 sm:$0x3] }
 0x40d   :  { %3160 = vmatprep.subr.bf16.mxu1 %v2971_v44  ;;  %v3012_v44 = vld [vmem:[#allocation6 + $0x470] sm:$0xff] }
 0x410   :  { %3161 = vmatpush1.bf16.msra.mxu1 %v2970_v2  ;;  %v2869_v2 = vpack.c.bf16 %v2860_v49, %v2860_v49 }
 0x411   :  { %3162 = vmatprep.subr.bf16.mxu1 %v2973_v48  ;;  %v3017_v48 = vsub.s32 2, %v5075_v23 }
 0x414   :  { %3163 = vmatpush1.bf16.msra.mxu1 %v2972_v50  ;;  %v3021_v50 = vsub.s32 6, %v5075_v23 }
 0x415   :  { %3164 = vmatprep.subr.bf16.mxu1 %v2975_v11  ;;  %v3018_v11 = vrot.slane %v5083_v46, %v3017_v48 }
 0x418   :  { %3165 = vmatpush1.bf16.msra.mxu1 %v2974_v54  ;;  %v3022_v54 = vrot.slane %v5083_v46, %v3021_v50 }
 0x419   :  { %3166 = vmatprep.subr.bf16.mxu1 %v2977_v56  ;;  %v3028_v56 = vrot.slane %v3018_v11, %v3017_v48 }
 0x41c   :  { %3167 = vmatpush1.bf16.msra.mxu1 %v2976_v55  ;;  %v3032_v55 = vrot.slane %v3022_v54, %v3017_v48 }
 0x41d   :  { %3168 = vmatprep.subr.bf16.mxu1 %v2979_v57 }
 0x420   :  { %3169 = vmatpush1.bf16.msra.mxu1 %v2978_v24 }
 0x421   :  { %3170 = vmatprep.subr.bf16.mxu1 %v2981_v42 }
 0x424   :  { %3171 = vmatpush1.bf16.msra.mxu1 %v2980_v59 }
 0x425   :  { %3172 = vmatprep.subr.bf16.mxu1 %v2983_v51 }
 0x428   :  { %3173 = vmatpush1.bf16.msra.mxu1 %v2982_v63 }
 0x429   :  { %3174 = vmatprep.subr.bf16.mxu1 %v2985_v45 }
 0x42c   :  { %3175 = vmatpush1.bf16.msra.mxu1 %v2984_v12 }
 0x42d   :  { %3176 = vmatprep.subr.bf16.mxu1 %v2987_v0 }
 0x430   :  { %3177 = vmatpush1.bf16.msra.mxu1 %v2986_v47 }
 0x431   :  { %3178 = vmatprep.subr.bf16.mxu1 %v2989_v4 }
 0x434   :  { %3179 = vmatpush1.bf16.msra.mxu1 %v2988_v6 }
 0x435   :  { %3180 = vmatprep.subr.bf16.mxu1 %v2991_v15 }
 0x438   :  { %3181 = vmatpush1.bf16.msra.mxu1 %v2990_v18 }
 0x439   :  { %3182 = vmatprep.subr.bf16.mxu1 %v2993_v60 }
 0x43c   :  { %3183 = vmatpush1.bf16.msra.mxu1 %v2992_v52 }
 0x43d   :  { %3184 = vmatprep.subr.bf16.mxu1 %v2995_v7 }
 0x440   :  { %3185 = vmatpush1.bf16.msra.mxu1 %v2994_v9 }
 0x441   :  { %3186 = vmatprep.subr.bf16.mxu1 %v2997_v41 }
 0x444   :  { %3187 = vmatpush1.bf16.msra.mxu1 %v2996_v1 }
 0x445   :  { %3197 = vmatprep.subr.bf16.mxu1 %v2999_v13 }
 0x447   :  { %3189 = vmatmul.mubr.bf16.vlgmr.msra.gmra.mrb[16].mxu1 %v2867_v19 }
 0x448   :  { %3198 = vmatpush1.bf16.msra.mxu1 %v2998_v58  ;;  %3229 = vmatprep.mubr.bf16.mxu1 %v3916_v61  ;;  %v3010_v61 = vld [vmem:[#allocation6 + $0x460] sm:$0xff] }
 0x449   :  { %3199 = vmatprep.subr.bf16.mxu1 %v3001_v14 }
 0x44c   :  { %3200 = vmatpush1.bf16.msra.mxu1 %v3000_v62 }
 0x44d   :  { %3201 = vmatprep.subr.bf16.mxu1 %v3003_v53 }
 0x450   :  { %3202 = vmatpush1.bf16.msra.mxu1 %v3002_v8 }
 0x451   :  { %3203 = vmatprep.subr.bf16.mxu1 %v3005_v20 }
 0x454   :  { %3204 = vmatpush1.bf16.msra.mxu1 %v3004_v3 }
 0x455   :  { %3205 = vmatprep.subr.bf16.mxu1 %v3007_v21 }
 0x458   :  { %3206 = vmatpush1.bf16.msra.mxu1 %v3006_v5 }
 0x459   :  { %3207 = vmatprep.subr.bf16.mxu1 %v3009_v22 }
 0x45c   :  { %3208 = vmatpush1.bf16.msra.mxu1 %v3008_v16 }
 0x45d   :  { %3209 = vmatprep.subr.bf16.mxu1 %v3011_v17 }
 0x460   :  { %3210 = vmatpush1.bf16.msra.mxu1 %v3010_v61 }
 0x461   :  { %3211 = vmatprep.subr.bf16.mxu1 %v3013_v43 }
 0x464   :  { %3212 = vmatpush1.bf16.msra.mxu1 %v3012_v44 }
 0x467   :  { %3230 = vmatmul.mubr.bf16.vlgmr.msra.gmra.mrb[16].mxu1 %v2869_v2 }
 0x53a   :  { %v3231_v57 = vpop.f32.mrb[16].mxu1 }
 0x53b   :  { %v3724_v24 = vadd.f32 %v3231_v57, %v3028_v56  ;;  %v3233_v42 = vpop.f32.mrb[17].mxu1 }
 0x53c   :  { %v3725_v59 = vadd.f32 %v3233_v42, %v3032_v55  ;;  %v3235_v51 = vpop.f32.mrb[18].mxu1 }
 0x53d   :  { %v3238_v63 = vmax.f32 %v3724_v24, 0.0  ;;  %v3236_v45 = vpop.f32.mrb[19].mxu1 }
 0x53e   :  { %v3239_v12 = vmax.f32 %v3725_v59, 0.0 }
 0x540   :  { %v3245_v0 = vpack.c.bf16 %v3239_v12, %v3239_v12 }
 0x541   :  { %3912 = dma.done.wait [#allocation8 + $0x1], 2048 }
 0x542   :  { %3913 = vsyncadd [#allocation8 + $0x1], 4294965248  ;;  %3679 = vmatpush3.bf16.msra.mxu0 %v4602_v25  ;;  %3298 = vmatprep.mubr.bf16.mxu0 %v3245_v0  ;;  %v3244_v25 = vpack.c.bf16 %v3238_v63, %v3238_v63  ;;  %vm3306_vm1 = vcmask 1041408   ;;  %s3917_s1 = smov [#allocation9]  }
 0x543   :  { %3680 = vmatprep.subr.bf16.mxu0 %v4647_v34  ;;  %s3325_s20 = sshll.u32 %s3917_s1, 4  ;;  %s3326_s20 = int_to_ptr.vmem [resolvable:$true] %s3325_s20 }
 0x544   :  { %s3888_s21 = scalar_lea.vmem %s3326_s20, 32  ;;  %p3893_p1 = scmp.lt.s32.totalorder %s3326_s20, %s3326_s20 }
 0x545   :  { %p3889_p0 = scmp.ne.s32.totalorder %s3326_s20, %s3888_s21  ;;  %p3894_p2 = scmp.lt.s32.totalorder %s3888_s21, %s3888_s21 }
 0x546   :  { %3681 = vmatpush3.bf16.msra.mxu0 %v4607_v26  ;;  %v3264_v26 = vsub.s32 3, %v5075_v23 }
 0x547   :  { %3682 = vmatprep.subr.bf16.mxu0 %v4652_v35  ;;  %p3895_p3 = por %p3894_p2, %p3893_p1 }
 0x549   :  { %p3896_p4 = pnand %p3895_p3, %p3889_p0 }
 0x54a   :  { %3683 = vmatpush3.bf16.msra.mxu0 %v4612_v27 }
 0x54b   :  { %3684 = vmatprep.subr.bf16.mxu0 %v4657_v36 }
 0x54e   :  { %3685 = vmatpush3.bf16.msra.mxu0 %v4617_v28  ;;  %v3265_v28 = vrot.slane %v5083_v46, %v3264_v26 }
 0x54f   :  { %3686 = vmatprep.subr.bf16.mxu0 %v4662_v37 }
 0x552   :  { %3687 = vmatpush3.bf16.msra.mxu0 %v4622_v29 }
 0x553   :  { %3688 = vmatprep.subr.bf16.mxu0 %v4667_v38 }
 0x556   :  { %3689 = vmatpush3.bf16.msra.mxu0 %v4627_v30 }
 0x557   :  { %3690 = vmatprep.subr.bf16.mxu0 %v4672_v39 }
 0x55a   :  { %3691 = vmatpush3.bf16.msra.mxu0 %v4632_v31 }
 0x55b   :  { %3692 = vmatprep.subr.bf16.mxu0 %v4677_v40 }
 0x55e   :  { %3693 = vmatpush3.bf16.msra.mxu0 %v4637_v32 }
 0x561   :  { %3299 = vmatmul.mubr.bf16.vlgmr.msra.gmra.mrb[120].mxu0 %v3244_v25 }
 0x634   :  { %v3694_v27 = vpop.f32.mrb[120].mxu0 }
 0x635   :  { %v3695_v29 = vpop.f32.mrb[121].mxu0 }
 0x636   :  { %v3696_v33 = vadd.f32 %v3695_v29, %v3694_v27  ;;  %v3697_v34 = vpop.f32.mrb[122].mxu0 }
 0x637   :  { %v3698_v35 = vpop.f32.mrb[123].mxu0 }
 0x638   :  { %v3301_v30 = vadd.f32 %v3696_v33, %v3265_v28 }
 0x63a   :  { %v3307_v36 = vsel %vm3306_vm1, %v3301_v30, -inf }
 0x63b   :  { %3308 = vmax.xlane.f32.xlu0 %v3307_v36 }
 0x6c8   :  { %v3309_v31 = vpop.xlane.xlu0 %3308 }
 0x6c9   :  { %v3310_v37 = vsub.f32 %v3301_v30, %v3309_v31 }
 0x6cb   :  { %v3311_v38 = vmul.f32 1.442695, %v3310_v37 }
 0x6cd   :  { %3884 = vpow2.f32 %v3311_v38 }
 0x6d7   :  { %v3885_v39 = vpop.eup %3884 }
 0x6d8   :  { %v3313_v32 = vsel %vm3306_vm1, %v3885_v39, 0.0 }
 0x6d9   :  { %3314 = vadd.xlane.f32.xlu0 %v3313_v32 }
 0x766   :  { %v3315_v40 = vpop.xlane.xlu0 %3314 }
 0x767   :  { %3886 = vrcp.f32 %v3315_v40 }
 0x771   :  { %v3887_v23 = vpop.eup %3886 }
 0x772   :  { %v3317_v46 = vmul.f32 %v3887_v23, %v3885_v39 }
 0x774   :  { %3318 = vst [vmem:[#allocation9] sm:$0x3] %v3317_v46 }
 0x775   :  { %3899 = shalt.err (!%p3896_p4)
}
 0x776   :  { %s3900_s24 = scalar_lea.hbm %s5216_s5, 32 }
 0x777   :  { %p3901_p5 = scmp.ne.s32.totalorder %s5216_s5, %s3900_s24  ;;  %p3904_p6 = scmp.lt.u32.totalorder %s3900_s24, %s5216_s5 }
 0x779   :  { %p3906_p7 = pnand %p3904_p6, %p3901_p5 }
 0x77b   :  { %3909 = shalt.err (!%p3906_p7)
}
 0x77c   :  { %3328 = dma.vmem_to_hbm [thread:$0]  %s3326_s20, 32, %s5216_s5, [#allocation10]  }
 0x77d   :  { %3914 = dma.done.wait [#allocation10], 32  }
 0x77e   :  { %3915 = vsyncadd [#allocation10], 4294967264 }
 0x77f   :  { %3332 = vsyncpa [#allocation10], 1 }
 0x780   :  { %3333 = vsyncmov [#allocation8] }
 0x783   :  { %s3334_s6 = vpop.sfrf %3333 }
 0x784   :  { %p3496_p8 = scmp.ne.s32.totalorder %s3334_s6, 0 }
 0x786   :  { %3338 = shalt.err (%p3496_p8)  }
 0x787   :  { %3340 = vsyncmov [#allocation8 + $0x1] }
 0x78a   :  { %s3341_s7 = vpop.sfrf %3340 }
 0x78b   :  { %p3497_p9 = scmp.ne.s32.totalorder %s3341_s7, 0 }
 0x78d   :  { %3345 = shalt.err (%p3497_p9)  }

</bundles_post_ra>
